<compile_context>
chip_gen: v6e
topology: v6e:2x2x1
jax: 0.10.0
libtpu: 0.0.40
codegen_flags: <defaults>
</compile_context>

<pallas_src>
import functools

import jax
import jax.numpy as jnp
from jax.experimental import pallas as pl
from jax.experimental.pallas import tpu as pltpu

INPUT_DIM = 13
HIDDEN = 64      # true LSTM hidden size
HP = 128         # hidden padded to one 128-lane vreg tile per gate


def _pick_chunk(n, max_chunk):
    """Largest divisor of n that is <= max_chunk."""
    best = 1
    for c in range(1, min(n, max_chunk) + 1):
        if n % c == 0:
            best = c
    return best


def _lstm_kernel(xp_ref, whh_ref, fcw_ref, fcb_ref, out_ref,
                 h_ref, c_ref, *, hp, t_chunk, unroll):
    tc = pl.program_id(1)

    @pl.when(tc == 0)
    def _():
        h_ref[...] = jnp.zeros_like(h_ref)
        c_ref[...] = jnp.zeros_like(c_ref)

    def step(s, carry):
        h, c = carry
        # Only the recurrent matmul lives inside the serial loop; the input
        # projection (incl. both biases) was precomputed time-parallel.
        gates = xp_ref[s] + jnp.dot(h.astype(jnp.bfloat16), whh_ref[...],
                                    preferred_element_type=jnp.float32)
        # Gate layout [i | f | o | g], each gate in its own 128-lane block,
        # so every slice below is a free vreg-aligned subview.
        sig = jax.nn.sigmoid(gates[:, :3 * hp])
        i_g = sig[:, 0 * hp:1 * hp]
        f_g = sig[:, 1 * hp:2 * hp]
        o_g = sig[:, 2 * hp:3 * hp]
        g_g = jnp.tanh(gates[:, 3 * hp:])
        c = f_g * c + i_g * g_g
        h = o_g * jnp.tanh(c)
        return (h, c)

    h, c = jax.lax.fori_loop(0, t_chunk, step, (h_ref[...], c_ref[...]),
                             unroll=unroll)
    h_ref[...] = h
    c_ref[...] = c

    @pl.when(tc == pl.num_programs(1) - 1)
    def _():
        # Linear(64 -> 1) + sigmoid as VPU mul + lane reduce (padding lanes of
        # fc_w are zero, so they drop out of the reduction).
        logits = (jnp.sum(h * fcw_ref[...], axis=-1, keepdims=True)
                  + fcb_ref[...])
        out_ref[...] = jax.nn.sigmoid(logits)


def lstm_classifier_pallas(x, params):
    """x: (B, T, INPUT_DIM) float32 -> (B, 1) float32."""
    w_ih, w_hh, b_ih, b_hh, fc_w, fc_b = params
    B, T, I = x.shape
    H = HIDDEN
    assert I == INPUT_DIM

    # ---- reorder PyTorch gate order [i, f, g, o] -> [i, f, o, g]
    perm = jnp.concatenate([jnp.arange(0, H), jnp.arange(H, 2 * H),
                            jnp.arange(3 * H, 4 * H), jnp.arange(2 * H, 3 * H)])
    w_ih_r = w_ih[perm]                      # (4H, I)
    w_hh_r = w_hh[perm]                      # (4H, H)
    b_r = (b_ih + b_hh)[perm]                # (4H,)

    # ---- pad every gate block H=64 -> HP=128 lanes.  Padded pre-activations
    #      are exactly 0 => i/f/o pad = 0.5, g pad = 0 => padded c/h lanes stay 0.
    def pad_gates(w):
        out = jnp.zeros((4 * HP,) + w.shape[1:], w.dtype)
        for g in range(4):
            out = out.at[g * HP:g * HP + H].set(w[g * H:(g + 1) * H])
        return out

    w_ih_p = pad_gates(w_ih_r)                                        # (4*HP, I)
    w_hh_p = jnp.zeros((4 * HP, HP), w_hh.dtype).at[:, :H].set(
        pad_gates(w_hh_r))                                            # (4*HP, HP)
    b_p = pad_gates(b_r)                                              # (4*HP,)

    # ---- pad batch to the f32 sublane tile; cap batch tile (vreg pressure);
    #      extra batch goes to the parallel grid axis.
    B_pad = max(8, ((B + 7) // 8) * 8)
    TB = min(B_pad, 32)
    B_pad = ((B_pad + TB - 1) // TB) * TB
    x_p = jnp.zeros((B_pad, T, I), jnp.float32).at[:B].set(
        x.astype(jnp.float32))

    # ---- hoisted time-parallel input projection (bf16 MXU, f32 accumulate)
    #      x_proj[t, b, :] = x[b, t] @ W_ih^T + (b_ih + b_hh)   -> (T, B_pad, 4*HP)
    x_proj = jnp.einsum("bti,gi->tbg",
                        x_p.astype(jnp.bfloat16),
                        w_ih_p.astype(jnp.bfloat16),
                        preferred_element_type=jnp.float32) + b_p[None, None, :]
    x_proj = x_proj.astype(jnp.float32)

    # ---- many timesteps per grid step to amortize grid overhead.
    TC = _pick_chunk(T, 32)
    unroll = True if TC <= 16 else 8

    whh_t = jnp.transpose(w_hh_p).astype(jnp.bfloat16)        # (HP, 4*HP) bf16
    fcw_row = jnp.zeros((1, HP), jnp.float32).at[0, :H].set(
        fc_w.reshape(H).astype(jnp.float32))                   # (1, HP)
    fcb = fc_b.reshape(1, 1).astype(jnp.float32)               # (1, 1)

    kernel = functools.partial(_lstm_kernel, hp=HP, t_chunk=TC, unroll=unroll)

    out = pl.pallas_call(
        kernel,
        out_shape=jax.ShapeDtypeStruct((B_pad, 1), jnp.float32),
        grid_spec=pltpu.PrefetchScalarGridSpec(
            num_scalar_prefetch=0,
            grid=(B_pad // TB, T // TC),            # (batch blocks, time chunks)
            in_specs=[
                pl.BlockSpec((TC, TB, 4 * HP), lambda b, t: (t, b, 0)),  # x_proj
                pl.BlockSpec((HP, 4 * HP), lambda b, t: (0, 0)),         # W_hh^T
                pl.BlockSpec((1, HP), lambda b, t: (0, 0)),              # fc_w row
                pl.BlockSpec((1, 1), lambda b, t: (0, 0)),               # fc_b
            ],
            out_specs=pl.BlockSpec((TB, 1), lambda b, t: (b, 0)),
            scratch_shapes=[
                pltpu.VMEM((TB, HP), jnp.float32),   # h carry (f32)
                pltpu.VMEM((TB, HP), jnp.float32),   # c carry (f32)
            ],
        ),
        compiler_params=pltpu.CompilerParams(
            # batch axis parallel (v7x megacore), time axis is the recurrence.
            dimension_semantics=("parallel", "arbitrary")),
    )(x_proj, whh_t, fcw_row, fcb)
    return out[:B]


def lstm_classifier_ref(x, params):
    """Pure-JAX (f32) reference of the PyTorch forward pass."""
    w_ih, w_hh, b_ih, b_hh, fc_w, fc_b = params
    B, T, _ = x.shape
    H = HIDDEN
    h = jnp.zeros((B, H), jnp.float32)
    c = jnp.zeros((B, H), jnp.float32)

    def step(carry, x_t):
        h, c = carry
        gates = x_t @ w_ih.T + h @ w_hh.T + b_ih + b_hh
        i = jax.nn.sigmoid(gates[:, 0 * H:1 * H])
        f = jax.nn.sigmoid(gates[:, 1 * H:2 * H])
        g = jnp.tanh(gates[:, 2 * H:3 * H])
        o = jax.nn.sigmoid(gates[:, 3 * H:4 * H])
        c = f * c + i * g
        h = o * jnp.tanh(c)
        return (h, c), None

    (h, _), _ = jax.lax.scan(step, (h, c), jnp.transpose(x, (1, 0, 2)))
    return jax.nn.sigmoid(h @ fc_w.T + fc_b)


def init_params(key):
    H, I = HIDDEN, INPUT_DIM
    k = 1.0 / jnp.sqrt(jnp.float32(H))
    keys = jax.random.split(key, 6)
    w_ih = jax.random.uniform(keys[0], (4 * H, I), jnp.float32, -k, k)
    w_hh = jax.random.uniform(keys[1], (4 * H, H), jnp.float32, -k, k)
    b_ih = jax.random.uniform(keys[2], (4 * H,), jnp.float32, -k, k)
    b_hh = jax.random.uniform(keys[3], (4 * H,), jnp.float32, -k, k)
    fc_w = jax.random.uniform(keys[4], (1, H), jnp.float32, -k, k)
    fc_b = jax.random.uniform(keys[5], (1,), jnp.float32, -k, k)
    return w_ih, w_hh, b_ih, b_hh, fc_w, fc_b


if __name__ == "__main__":
    key = jax.random.PRNGKey(0)
    pkey, xkey = jax.random.split(key)
    params = init_params(pkey)

    B, T = 2, 8
    x = jax.random.normal(xkey, (B, T, INPUT_DIM), jnp.float32)

    out = jax.block_until_ready(lstm_classifier_pallas(x, params))
    ref = jax.block_until_ready(lstm_classifier_ref(x, params))

    assert out.shape == (B, 1)
    # bf16 MXU operands (f32 accumulation) -> compare at bf16-appropriate tol.
    assert jnp.allclose(out, ref, atol=1e-2, rtol=1e-2), (out, ref)

    print("KERNEL_OK")
</pallas_src>

<mosaic_0001>
module attributes {stable_mosaic.version = 11 : i64} {
  func.func @_lstm_kernel(%arg0: i32, %arg1: i32, %arg2: memref<8x8x512xf32, #tpu.memory_space<vmem>>, %arg3: memref<128x512xbf16, #tpu.memory_space<vmem>>, %arg4: memref<1x128xf32, #tpu.memory_space<vmem>>, %arg5: memref<1x1xf32, #tpu.memory_space<vmem>>, %arg6: memref<8x1xf32, #tpu.memory_space<vmem>>, %arg7: memref<8x128xf32, #tpu.memory_space<vmem>>, %arg8: memref<8x128xf32, #tpu.memory_space<vmem>>) attributes {dimension_semantics = [#tpu.dimension_semantics<parallel>, #tpu.dimension_semantics<arbitrary>], iteration_bounds = array<i64: 1, 1>, scalar_prefetch = 0 : i64, scratch_operands = 2 : i64, tpu.core_type = #tpu.core_type<tc>, window_params = [{transform_indices = @transform_0, window_bounds = array<i64: 8, 8, 512>}, {pipeline_mode = #tpu.pipeline_mode<synchronous>, transform_indices = @transform_1, window_bounds = array<i64: 128, 512>}, {pipeline_mode = #tpu.pipeline_mode<synchronous>, transform_indices = @transform_2, window_bounds = array<i64: 1, 128>}, {pipeline_mode = #tpu.pipeline_mode<synchronous>, transform_indices = @transform_3, window_bounds = array<i64: 1, 1>}, {transform_indices = @transform_4, window_bounds = array<i64: 8, 1>}]} {
    %c0_i32 = arith.constant 0 : i32
    %0 = arith.cmpi eq, %arg1, %c0_i32 : i32
    %1 = arith.extui %0 : i1 to i32
    %c0_i32_0 = arith.constant 0 : i32
    %2 = arith.cmpi ne, %1, %c0_i32_0 : i32
    scf.if %2 {
      %cst_58 = arith.constant 0.000000e+00 : f32
      %194 = vector.broadcast %cst_58 : f32 to vector<8x128xf32>
      %c0_59 = arith.constant 0 : index
      %c0_60 = arith.constant 0 : index
      %195 = vector.load %arg7[%c0_59, %c0_60] : memref<8x128xf32, #tpu.memory_space<vmem>>, vector<8x128xf32>
      tpu.vector_store %arg7[%c0_59, %c0_60], %194 {strides = array<i32>} : memref<8x128xf32, #tpu.memory_space<vmem>>, vector<8x128xf32>,
      %cst_61 = arith.constant 0.000000e+00 : f32
      %196 = vector.broadcast %cst_61 : f32 to vector<8x128xf32>
      %c0_62 = arith.constant 0 : index
      %c0_63 = arith.constant 0 : index
      %197 = vector.load %arg8[%c0_62, %c0_63] : memref<8x128xf32, #tpu.memory_space<vmem>>, vector<8x128xf32>
      tpu.vector_store %arg8[%c0_62, %c0_63], %196 {strides = array<i32>} : memref<8x128xf32, #tpu.memory_space<vmem>>, vector<8x128xf32>,
    } else {
    }
    %c0 = arith.constant 0 : index
    %c0_1 = arith.constant 0 : index
    %3 = vector.load %arg7[%c0, %c0_1] : memref<8x128xf32, #tpu.memory_space<vmem>>, vector<8x128xf32>
    %c0_2 = arith.constant 0 : index
    %c0_3 = arith.constant 0 : index
    %4 = vector.load %arg8[%c0_2, %c0_3] : memref<8x128xf32, #tpu.memory_space<vmem>>, vector<8x128xf32>
    %c0_i32_4 = arith.constant 0 : i32
    %5 = arith.index_cast %c0_i32_4 : i32 to index
    %c0_5 = arith.constant 0 : index
    %c0_6 = arith.constant 0 : index
    %6 = vector.load %arg2[%5, %c0_5, %c0_6] : memref<8x8x512xf32, #tpu.memory_space<vmem>>, vector<1x8x512xf32>
    %7 = vector.shape_cast %6 : vector<1x8x512xf32> to vector<8x512xf32>
    %8 = arith.truncf %3 : vector<8x128xf32> to vector<8x128xbf16>
    %c0_7 = arith.constant 0 : index
    %c0_8 = arith.constant 0 : index
    %9 = vector.load %arg3[%c0_7, %c0_8] : memref<128x512xbf16, #tpu.memory_space<vmem>>, vector<128x512xbf16>
    %cst = arith.constant dense<0.000000e+00> : vector<8x512xf32>
    %10 = tpu.matmul %8, %9, %cst {dimension_numbers = #tpu.dot_dimension_numbers<[1], [0], [0], [1], [0, 0, 1, 1], [], []>} : vector<8x128xbf16>, vector<128x512xbf16>, vector<8x512xf32> -> vector<8x512xf32>
    %11 = arith.addf %7, %10 : vector<8x512xf32>
    %12 = vector.extract_strided_slice %11 {offsets = [0, 0], sizes = [8, 384], strides = [1, 1]} : vector<8x512xf32> to vector<8x384xf32>
    %13 = arith.negf %12 : vector<8x384xf32>
    %14 = math.exp %13 : vector<8x384xf32>
    %cst_9 = arith.constant 1.000000e+00 : f32
    %15 = vector.broadcast %cst_9 : f32 to vector<8x384xf32>
    %16 = arith.addf %15, %14 : vector<8x384xf32>
    %17 = arith.divf %15, %16 : vector<8x384xf32>
    %18 = vector.extract_strided_slice %17 {offsets = [0, 0], sizes = [8, 128], strides = [1, 1]} : vector<8x384xf32> to vector<8x128xf32>
    %19 = vector.extract_strided_slice %17 {offsets = [0, 128], sizes = [8, 128], strides = [1, 1]} : vector<8x384xf32> to vector<8x128xf32>
    %20 = vector.extract_strided_slice %17 {offsets = [0, 256], sizes = [8, 128], strides = [1, 1]} : vector<8x384xf32> to vector<8x128xf32>
    %21 = vector.extract_strided_slice %11 {offsets = [0, 384], sizes = [8, 128], strides = [1, 1]} : vector<8x512xf32> to vector<8x128xf32>
    %22 = math.tanh %21 : vector<8x128xf32>
    %23 = arith.mulf %19, %4 : vector<8x128xf32>
    %24 = arith.mulf %18, %22 : vector<8x128xf32>
    %25 = arith.addf %23, %24 : vector<8x128xf32>
    %26 = math.tanh %25 : vector<8x128xf32>
    %27 = arith.mulf %20, %26 : vector<8x128xf32>
    %c1_i32 = arith.constant 1 : i32
    %28 = arith.index_cast %c1_i32 : i32 to index
    %c0_10 = arith.constant 0 : index
    %c0_11 = arith.constant 0 : index
    %29 = vector.load %arg2[%28, %c0_10, %c0_11] : memref<8x8x512xf32, #tpu.memory_space<vmem>>, vector<1x8x512xf32>
    %30 = vector.shape_cast %29 : vector<1x8x512xf32> to vector<8x512xf32>
    %31 = arith.truncf %27 : vector<8x128xf32> to vector<8x128xbf16>
    %c0_12 = arith.constant 0 : index
    %c0_13 = arith.constant 0 : index
    %32 = vector.load %arg3[%c0_12, %c0_13] : memref<128x512xbf16, #tpu.memory_space<vmem>>, vector<128x512xbf16>
    %cst_14 = arith.constant dense<0.000000e+00> : vector<8x512xf32>
    %33 = tpu.matmul %31, %32, %cst_14 {dimension_numbers = #tpu.dot_dimension_numbers<[1], [0], [0], [1], [0, 0, 1, 1], [], []>} : vector<8x128xbf16>, vector<128x512xbf16>, vector<8x512xf32> -> vector<8x512xf32>
    %34 = arith.addf %30, %33 : vector<8x512xf32>
    %35 = vector.extract_strided_slice %34 {offsets = [0, 0], sizes = [8, 384], strides = [1, 1]} : vector<8x512xf32> to vector<8x384xf32>
    %36 = arith.negf %35 : vector<8x384xf32>
    %37 = math.exp %36 : vector<8x384xf32>
    %cst_15 = arith.constant 1.000000e+00 : f32
    %38 = vector.broadcast %cst_15 : f32 to vector<8x384xf32>
    %39 = arith.addf %38, %37 : vector<8x384xf32>
    %40 = arith.divf %38, %39 : vector<8x384xf32>
    %41 = vector.extract_strided_slice %40 {offsets = [0, 0], sizes = [8, 128], strides = [1, 1]} : vector<8x384xf32> to vector<8x128xf32>
    %42 = vector.extract_strided_slice %40 {offsets = [0, 128], sizes = [8, 128], strides = [1, 1]} : vector<8x384xf32> to vector<8x128xf32>
    %43 = vector.extract_strided_slice %40 {offsets = [0, 256], sizes = [8, 128], strides = [1, 1]} : vector<8x384xf32> to vector<8x128xf32>
    %44 = vector.extract_strided_slice %34 {offsets = [0, 384], sizes = [8, 128], strides = [1, 1]} : vector<8x512xf32> to vector<8x128xf32>
    %45 = math.tanh %44 : vector<8x128xf32>
    %46 = arith.mulf %42, %25 : vector<8x128xf32>
    %47 = arith.mulf %41, %45 : vector<8x128xf32>
    %48 = arith.addf %46, %47 : vector<8x128xf32>
    %49 = math.tanh %48 : vector<8x128xf32>
    %50 = arith.mulf %43, %49 : vector<8x128xf32>
    %c2_i32 = arith.constant 2 : i32
    %51 = arith.index_cast %c2_i32 : i32 to index
    %c0_16 = arith.constant 0 : index
    %c0_17 = arith.constant 0 : index
    %52 = vector.load %arg2[%51, %c0_16, %c0_17] : memref<8x8x512xf32, #tpu.memory_space<vmem>>, vector<1x8x512xf32>
    %53 = vector.shape_cast %52 : vector<1x8x512xf32> to vector<8x512xf32>
    %54 = arith.truncf %50 : vector<8x128xf32> to vector<8x128xbf16>
    %c0_18 = arith.constant 0 : index
    %c0_19 = arith.constant 0 : index
    %55 = vector.load %arg3[%c0_18, %c0_19] : memref<128x512xbf16, #tpu.memory_space<vmem>>, vector<128x512xbf16>
    %cst_20 = arith.constant dense<0.000000e+00> : vector<8x512xf32>
    %56 = tpu.matmul %54, %55, %cst_20 {dimension_numbers = #tpu.dot_dimension_numbers<[1], [0], [0], [1], [0, 0, 1, 1], [], []>} : vector<8x128xbf16>, vector<128x512xbf16>, vector<8x512xf32> -> vector<8x512xf32>
    %57 = arith.addf %53, %56 : vector<8x512xf32>
    %58 = vector.extract_strided_slice %57 {offsets = [0, 0], sizes = [8, 384], strides = [1, 1]} : vector<8x512xf32> to vector<8x384xf32>
    %59 = arith.negf %58 : vector<8x384xf32>
    %60 = math.exp %59 : vector<8x384xf32>
    %cst_21 = arith.constant 1.000000e+00 : f32
    %61 = vector.broadcast %cst_21 : f32 to vector<8x384xf32>
    %62 = arith.addf %61, %60 : vector<8x384xf32>
    %63 = arith.divf %61, %62 : vector<8x384xf32>
    %64 = vector.extract_strided_slice %63 {offsets = [0, 0], sizes = [8, 128], strides = [1, 1]} : vector<8x384xf32> to vector<8x128xf32>
    %65 = vector.extract_strided_slice %63 {offsets = [0, 128], sizes = [8, 128], strides = [1, 1]} : vector<8x384xf32> to vector<8x128xf32>
    %66 = vector.extract_strided_slice %63 {offsets = [0, 256], sizes = [8, 128], strides = [1, 1]} : vector<8x384xf32> to vector<8x128xf32>
    %67 = vector.extract_strided_slice %57 {offsets = [0, 384], sizes = [8, 128], strides = [1, 1]} : vector<8x512xf32> to vector<8x128xf32>
    %68 = math.tanh %67 : vector<8x128xf32>
    %69 = arith.mulf %65, %48 : vector<8x128xf32>
    %70 = arith.mulf %64, %68 : vector<8x128xf32>
    %71 = arith.addf %69, %70 : vector<8x128xf32>
    %72 = math.tanh %71 : vector<8x128xf32>
    %73 = arith.mulf %66, %72 : vector<8x128xf32>
    %c3_i32 = arith.constant 3 : i32
    %74 = arith.index_cast %c3_i32 : i32 to index
    %c0_22 = arith.constant 0 : index
    %c0_23 = arith.constant 0 : index
    %75 = vector.load %arg2[%74, %c0_22, %c0_23] : memref<8x8x512xf32, #tpu.memory_space<vmem>>, vector<1x8x512xf32>
    %76 = vector.shape_cast %75 : vector<1x8x512xf32> to vector<8x512xf32>
    %77 = arith.truncf %73 : vector<8x128xf32> to vector<8x128xbf16>
    %c0_24 = arith.constant 0 : index
    %c0_25 = arith.constant 0 : index
    %78 = vector.load %arg3[%c0_24, %c0_25] : memref<128x512xbf16, #tpu.memory_space<vmem>>, vector<128x512xbf16>
    %cst_26 = arith.constant dense<0.000000e+00> : vector<8x512xf32>
    %79 = tpu.matmul %77, %78, %cst_26 {dimension_numbers = #tpu.dot_dimension_numbers<[1], [0], [0], [1], [0, 0, 1, 1], [], []>} : vector<8x128xbf16>, vector<128x512xbf16>, vector<8x512xf32> -> vector<8x512xf32>
    %80 = arith.addf %76, %79 : vector<8x512xf32>
    %81 = vector.extract_strided_slice %80 {offsets = [0, 0], sizes = [8, 384], strides = [1, 1]} : vector<8x512xf32> to vector<8x384xf32>
    %82 = arith.negf %81 : vector<8x384xf32>
    %83 = math.exp %82 : vector<8x384xf32>
    %cst_27 = arith.constant 1.000000e+00 : f32
    %84 = vector.broadcast %cst_27 : f32 to vector<8x384xf32>
    %85 = arith.addf %84, %83 : vector<8x384xf32>
    %86 = arith.divf %84, %85 : vector<8x384xf32>
    %87 = vector.extract_strided_slice %86 {offsets = [0, 0], sizes = [8, 128], strides = [1, 1]} : vector<8x384xf32> to vector<8x128xf32>
    %88 = vector.extract_strided_slice %86 {offsets = [0, 128], sizes = [8, 128], strides = [1, 1]} : vector<8x384xf32> to vector<8x128xf32>
    %89 = vector.extract_strided_slice %86 {offsets = [0, 256], sizes = [8, 128], strides = [1, 1]} : vector<8x384xf32> to vector<8x128xf32>
    %90 = vector.extract_strided_slice %80 {offsets = [0, 384], sizes = [8, 128], strides = [1, 1]} : vector<8x512xf32> to vector<8x128xf32>
    %91 = math.tanh %90 : vector<8x128xf32>
    %92 = arith.mulf %88, %71 : vector<8x128xf32>
    %93 = arith.mulf %87, %91 : vector<8x128xf32>
    %94 = arith.addf %92, %93 : vector<8x128xf32>
    %95 = math.tanh %94 : vector<8x128xf32>
    %96 = arith.mulf %89, %95 : vector<8x128xf32>
    %c4_i32 = arith.constant 4 : i32
    %97 = arith.index_cast %c4_i32 : i32 to index
    %c0_28 = arith.constant 0 : index
    %c0_29 = arith.constant 0 : index
    %98 = vector.load %arg2[%97, %c0_28, %c0_29] : memref<8x8x512xf32, #tpu.memory_space<vmem>>, vector<1x8x512xf32>
    %99 = vector.shape_cast %98 : vector<1x8x512xf32> to vector<8x512xf32>
    %100 = arith.truncf %96 : vector<8x128xf32> to vector<8x128xbf16>
    %c0_30 = arith.constant 0 : index
    %c0_31 = arith.constant 0 : index
    %101 = vector.load %arg3[%c0_30, %c0_31] : memref<128x512xbf16, #tpu.memory_space<vmem>>, vector<128x512xbf16>
    %cst_32 = arith.constant dense<0.000000e+00> : vector<8x512xf32>
    %102 = tpu.matmul %100, %101, %cst_32 {dimension_numbers = #tpu.dot_dimension_numbers<[1], [0], [0], [1], [0, 0, 1, 1], [], []>} : vector<8x128xbf16>, vector<128x512xbf16>, vector<8x512xf32> -> vector<8x512xf32>
    %103 = arith.addf %99, %102 : vector<8x512xf32>
    %104 = vector.extract_strided_slice %103 {offsets = [0, 0], sizes = [8, 384], strides = [1, 1]} : vector<8x512xf32> to vector<8x384xf32>
    %105 = arith.negf %104 : vector<8x384xf32>
    %106 = math.exp %105 : vector<8x384xf32>
    %cst_33 = arith.constant 1.000000e+00 : f32
    %107 = vector.broadcast %cst_33 : f32 to vector<8x384xf32>
    %108 = arith.addf %107, %106 : vector<8x384xf32>
    %109 = arith.divf %107, %108 : vector<8x384xf32>
    %110 = vector.extract_strided_slice %109 {offsets = [0, 0], sizes = [8, 128], strides = [1, 1]} : vector<8x384xf32> to vector<8x128xf32>
    %111 = vector.extract_strided_slice %109 {offsets = [0, 128], sizes = [8, 128], strides = [1, 1]} : vector<8x384xf32> to vector<8x128xf32>
    %112 = vector.extract_strided_slice %109 {offsets = [0, 256], sizes = [8, 128], strides = [1, 1]} : vector<8x384xf32> to vector<8x128xf32>
    %113 = vector.extract_strided_slice %103 {offsets = [0, 384], sizes = [8, 128], strides = [1, 1]} : vector<8x512xf32> to vector<8x128xf32>
    %114 = math.tanh %113 : vector<8x128xf32>
    %115 = arith.mulf %111, %94 : vector<8x128xf32>
    %116 = arith.mulf %110, %114 : vector<8x128xf32>
    %117 = arith.addf %115, %116 : vector<8x128xf32>
    %118 = math.tanh %117 : vector<8x128xf32>
    %119 = arith.mulf %112, %118 : vector<8x128xf32>
    %c5_i32 = arith.constant 5 : i32
    %120 = arith.index_cast %c5_i32 : i32 to index
    %c0_34 = arith.constant 0 : index
    %c0_35 = arith.constant 0 : index
    %121 = vector.load %arg2[%120, %c0_34, %c0_35] : memref<8x8x512xf32, #tpu.memory_space<vmem>>, vector<1x8x512xf32>
    %122 = vector.shape_cast %121 : vector<1x8x512xf32> to vector<8x512xf32>
    %123 = arith.truncf %119 : vector<8x128xf32> to vector<8x128xbf16>
    %c0_36 = arith.constant 0 : index
    %c0_37 = arith.constant 0 : index
    %124 = vector.load %arg3[%c0_36, %c0_37] : memref<128x512xbf16, #tpu.memory_space<vmem>>, vector<128x512xbf16>
    %cst_38 = arith.constant dense<0.000000e+00> : vector<8x512xf32>
    %125 = tpu.matmul %123, %124, %cst_38 {dimension_numbers = #tpu.dot_dimension_numbers<[1], [0], [0], [1], [0, 0, 1, 1], [], []>} : vector<8x128xbf16>, vector<128x512xbf16>, vector<8x512xf32> -> vector<8x512xf32>
    %126 = arith.addf %122, %125 : vector<8x512xf32>
    %127 = vector.extract_strided_slice %126 {offsets = [0, 0], sizes = [8, 384], strides = [1, 1]} : vector<8x512xf32> to vector<8x384xf32>
    %128 = arith.negf %127 : vector<8x384xf32>
    %129 = math.exp %128 : vector<8x384xf32>
    %cst_39 = arith.constant 1.000000e+00 : f32
    %130 = vector.broadcast %cst_39 : f32 to vector<8x384xf32>
    %131 = arith.addf %130, %129 : vector<8x384xf32>
    %132 = arith.divf %130, %131 : vector<8x384xf32>
    %133 = vector.extract_strided_slice %132 {offsets = [0, 0], sizes = [8, 128], strides = [1, 1]} : vector<8x384xf32> to vector<8x128xf32>
    %134 = vector.extract_strided_slice %132 {offsets = [0, 128], sizes = [8, 128], strides = [1, 1]} : vector<8x384xf32> to vector<8x128xf32>
    %135 = vector.extract_strided_slice %132 {offsets = [0, 256], sizes = [8, 128], strides = [1, 1]} : vector<8x384xf32> to vector<8x128xf32>
    %136 = vector.extract_strided_slice %126 {offsets = [0, 384], sizes = [8, 128], strides = [1, 1]} : vector<8x512xf32> to vector<8x128xf32>
    %137 = math.tanh %136 : vector<8x128xf32>
    %138 = arith.mulf %134, %117 : vector<8x128xf32>
    %139 = arith.mulf %133, %137 : vector<8x128xf32>
    %140 = arith.addf %138, %139 : vector<8x128xf32>
    %141 = math.tanh %140 : vector<8x128xf32>
    %142 = arith.mulf %135, %141 : vector<8x128xf32>
    %c6_i32 = arith.constant 6 : i32
    %143 = arith.index_cast %c6_i32 : i32 to index
    %c0_40 = arith.constant 0 : index
    %c0_41 = arith.constant 0 : index
    %144 = vector.load %arg2[%143, %c0_40, %c0_41] : memref<8x8x512xf32, #tpu.memory_space<vmem>>, vector<1x8x512xf32>
    %145 = vector.shape_cast %144 : vector<1x8x512xf32> to vector<8x512xf32>
    %146 = arith.truncf %142 : vector<8x128xf32> to vector<8x128xbf16>
    %c0_42 = arith.constant 0 : index
    %c0_43 = arith.constant 0 : index
    %147 = vector.load %arg3[%c0_42, %c0_43] : memref<128x512xbf16, #tpu.memory_space<vmem>>, vector<128x512xbf16>
    %cst_44 = arith.constant dense<0.000000e+00> : vector<8x512xf32>
    %148 = tpu.matmul %146, %147, %cst_44 {dimension_numbers = #tpu.dot_dimension_numbers<[1], [0], [0], [1], [0, 0, 1, 1], [], []>} : vector<8x128xbf16>, vector<128x512xbf16>, vector<8x512xf32> -> vector<8x512xf32>
    %149 = arith.addf %145, %148 : vector<8x512xf32>
    %150 = vector.extract_strided_slice %149 {offsets = [0, 0], sizes = [8, 384], strides = [1, 1]} : vector<8x512xf32> to vector<8x384xf32>
    %151 = arith.negf %150 : vector<8x384xf32>
    %152 = math.exp %151 : vector<8x384xf32>
    %cst_45 = arith.constant 1.000000e+00 : f32
    %153 = vector.broadcast %cst_45 : f32 to vector<8x384xf32>
    %154 = arith.addf %153, %152 : vector<8x384xf32>
    %155 = arith.divf %153, %154 : vector<8x384xf32>
    %156 = vector.extract_strided_slice %155 {offsets = [0, 0], sizes = [8, 128], strides = [1, 1]} : vector<8x384xf32> to vector<8x128xf32>
    %157 = vector.extract_strided_slice %155 {offsets = [0, 128], sizes = [8, 128], strides = [1, 1]} : vector<8x384xf32> to vector<8x128xf32>
    %158 = vector.extract_strided_slice %155 {offsets = [0, 256], sizes = [8, 128], strides = [1, 1]} : vector<8x384xf32> to vector<8x128xf32>
    %159 = vector.extract_strided_slice %149 {offsets = [0, 384], sizes = [8, 128], strides = [1, 1]} : vector<8x512xf32> to vector<8x128xf32>
    %160 = math.tanh %159 : vector<8x128xf32>
    %161 = arith.mulf %157, %140 : vector<8x128xf32>
    %162 = arith.mulf %156, %160 : vector<8x128xf32>
    %163 = arith.addf %161, %162 : vector<8x128xf32>
    %164 = math.tanh %163 : vector<8x128xf32>
    %165 = arith.mulf %158, %164 : vector<8x128xf32>
    %c7_i32 = arith.constant 7 : i32
    %166 = arith.index_cast %c7_i32 : i32 to index
    %c0_46 = arith.constant 0 : index
    %c0_47 = arith.constant 0 : index
    %167 = vector.load %arg2[%166, %c0_46, %c0_47] : memref<8x8x512xf32, #tpu.memory_space<vmem>>, vector<1x8x512xf32>
    %168 = vector.shape_cast %167 : vector<1x8x512xf32> to vector<8x512xf32>
    %169 = arith.truncf %165 : vector<8x128xf32> to vector<8x128xbf16>
    %c0_48 = arith.constant 0 : index
    %c0_49 = arith.constant 0 : index
    %170 = vector.load %arg3[%c0_48, %c0_49] : memref<128x512xbf16, #tpu.memory_space<vmem>>, vector<128x512xbf16>
    %cst_50 = arith.constant dense<0.000000e+00> : vector<8x512xf32>
    %171 = tpu.matmul %169, %170, %cst_50 {dimension_numbers = #tpu.dot_dimension_numbers<[1], [0], [0], [1], [0, 0, 1, 1], [], []>} : vector<8x128xbf16>, vector<128x512xbf16>, vector<8x512xf32> -> vector<8x512xf32>
    %172 = arith.addf %168, %171 : vector<8x512xf32>
    %173 = vector.extract_strided_slice %172 {offsets = [0, 0], sizes = [8, 384], strides = [1, 1]} : vector<8x512xf32> to vector<8x384xf32>
    %174 = arith.negf %173 : vector<8x384xf32>
    %175 = math.exp %174 : vector<8x384xf32>
    %cst_51 = arith.constant 1.000000e+00 : f32
    %176 = vector.broadcast %cst_51 : f32 to vector<8x384xf32>
    %177 = arith.addf %176, %175 : vector<8x384xf32>
    %178 = arith.divf %176, %177 : vector<8x384xf32>
    %179 = vector.extract_strided_slice %178 {offsets = [0, 0], sizes = [8, 128], strides = [1, 1]} : vector<8x384xf32> to vector<8x128xf32>
    %180 = vector.extract_strided_slice %178 {offsets = [0, 128], sizes = [8, 128], strides = [1, 1]} : vector<8x384xf32> to vector<8x128xf32>
    %181 = vector.extract_strided_slice %178 {offsets = [0, 256], sizes = [8, 128], strides = [1, 1]} : vector<8x384xf32> to vector<8x128xf32>
    %182 = vector.extract_strided_slice %172 {offsets = [0, 384], sizes = [8, 128], strides = [1, 1]} : vector<8x512xf32> to vector<8x128xf32>
    %183 = math.tanh %182 : vector<8x128xf32>
    %184 = arith.mulf %180, %163 : vector<8x128xf32>
    %185 = arith.mulf %179, %183 : vector<8x128xf32>
    %186 = arith.addf %184, %185 : vector<8x128xf32>
    %187 = math.tanh %186 : vector<8x128xf32>
    %188 = arith.mulf %181, %187 : vector<8x128xf32>
    %c8_i32 = arith.constant 8 : i32
    %c0_52 = arith.constant 0 : index
    %c0_53 = arith.constant 0 : index
    %189 = vector.load %arg7[%c0_52, %c0_53] : memref<8x128xf32, #tpu.memory_space<vmem>>, vector<8x128xf32>
    tpu.vector_store %arg7[%c0_52, %c0_53], %188 {strides = array<i32>} : memref<8x128xf32, #tpu.memory_space<vmem>>, vector<8x128xf32>,
    %c0_54 = arith.constant 0 : index
    %c0_55 = arith.constant 0 : index
    %190 = vector.load %arg8[%c0_54, %c0_55] : memref<8x128xf32, #tpu.memory_space<vmem>>, vector<8x128xf32>
    tpu.vector_store %arg8[%c0_54, %c0_55], %186 {strides = array<i32>} : memref<8x128xf32, #tpu.memory_space<vmem>>, vector<8x128xf32>,
    %c0_i32_56 = arith.constant 0 : i32
    %191 = arith.cmpi eq, %arg1, %c0_i32_56 : i32
    %192 = arith.extui %191 : i1 to i32
    %c0_i32_57 = arith.constant 0 : i32
    %193 = arith.cmpi ne, %192, %c0_i32_57 : i32
    scf.if %193 {
      %c0_58 = arith.constant 0 : index
      %c0_59 = arith.constant 0 : index
      %194 = vector.load %arg4[%c0_58, %c0_59] : memref<1x128xf32, #tpu.memory_space<vmem>>, vector<1x128xf32>
      %195 = vector.broadcast %194 : vector<1x128xf32> to vector<8x128xf32>
      %196 = arith.mulf %188, %195 : vector<8x128xf32>
      %cst_60 = arith.constant dense<0.000000e+00> : vector<8xf32>
      %197 = vector.multi_reduction <add>, %196, %cst_60 [1] : vector<8x128xf32> to vector<8xf32>
      %198 = vector.shape_cast %197 : vector<8xf32> to vector<8x1xf32>
      %c0_61 = arith.constant 0 : index
      %c0_62 = arith.constant 0 : index
      %199 = vector.load %arg5[%c0_61, %c0_62] : memref<1x1xf32, #tpu.memory_space<vmem>>, vector<1x1xf32>
      %200 = vector.broadcast %199 : vector<1x1xf32> to vector<8x1xf32>
      %201 = arith.addf %198, %200 : vector<8x1xf32>
      %202 = arith.negf %201 : vector<8x1xf32>
      %203 = math.exp %202 : vector<8x1xf32>
      %cst_63 = arith.constant 1.000000e+00 : f32
      %204 = vector.broadcast %cst_63 : f32 to vector<8x1xf32>
      %205 = arith.addf %204, %203 : vector<8x1xf32>
      %206 = arith.divf %204, %205 : vector<8x1xf32>
      %c0_64 = arith.constant 0 : index
      %c0_65 = arith.constant 0 : index
      %207 = vector.load %arg6[%c0_64, %c0_65] : memref<8x1xf32, #tpu.memory_space<vmem>>, vector<8x1xf32>
      tpu.vector_store %arg6[%c0_64, %c0_65], %206 {strides = array<i32>} : memref<8x1xf32, #tpu.memory_space<vmem>>, vector<8x1xf32>,
    } else {
    }
    return
  }
  func.func @transform_0(%arg0: i32, %arg1: i32) -> (i32, i32, i32) {
    %c0_i32 = arith.constant 0 : i32
    %c0_i32_0 = arith.constant 0 : i32
    return %arg1, %arg0, %c0_i32 : i32, i32, i32
  }
  func.func @transform_1(%arg0: i32, %arg1: i32) -> (i32, i32) {
    %c0_i32 = arith.constant 0 : i32
    %c0_i32_0 = arith.constant 0 : i32
    %c0_i32_1 = arith.constant 0 : i32
    return %c0_i32, %c0_i32_0 : i32, i32
  }
  func.func @transform_2(%arg0: i32, %arg1: i32) -> (i32, i32) {
    %c0_i32 = arith.constant 0 : i32
    %c0_i32_0 = arith.constant 0 : i32
    %c0_i32_1 = arith.constant 0 : i32
    return %c0_i32, %c0_i32_0 : i32, i32
  }
  func.func @transform_3(%arg0: i32, %arg1: i32) -> (i32, i32) {
    %c0_i32 = arith.constant 0 : i32
    %c0_i32_0 = arith.constant 0 : i32
    %c0_i32_1 = arith.constant 0 : i32
    return %c0_i32, %c0_i32_0 : i32, i32
  }
  func.func @transform_4(%arg0: i32, %arg1: i32) -> (i32, i32) {
    %c0_i32 = arith.constant 0 : i32
    %c0_i32_0 = arith.constant 0 : i32
    return %arg0, %c0_i32 : i32, i32
  }
}

</mosaic_0001>

<bundles_post_ra>
// kernel: tpu_custom_call.1
= control target key start
LH: loop header
LB: loop body
LE: loop exit
PB: predicated region body
PF: predicated region fallthrough
CT: control target
= control target key end

     0   :  { %s1911_s0 = inlined_call_operand.hbm [shape: f32[8,8,512], index: 0, kind: input, shape index: {}]   ;;  %s1912_s1 = inlined_call_operand.hbm [shape: bf16[128,512], index: 1, kind: input, shape index: {}]   ;;  %s1913_s2 = inlined_call_operand.vmem [shape: f32[1,128], index: 2, kind: input, shape index: {}]   ;;  %s1914_s3 = inlined_call_operand.<no memory space> [shape: f32[1,1], index: 3, kind: input, shape index: {}]   ;;  %s1915_s4 = inlined_call_operand.vmem [shape: f32[8,1], index: 4, kind: output, shape index: {}]  }
   0x1   :  { %v9_v0 = vstv %s1914_s3 }
   0x2   :  { %10 = vst [vmem:[#allocation4] sm:$0x1] %v9_v0 }
   0x3   :  { %11 = vsyncpa [#allocation6], 0 }
   0x4   :  { %12 = vsyncpa [#allocation8], 0  ;;  %s1534_s17 = smov [#allocation5]  }
   0x5   :  { %s18_s18 = sshll.u32 %s1534_s17, 4  ;;  %s19_s18 = int_to_ptr.vmem [resolvable:$true] %s18_s18 }
   0x6   :  { %s1498_s19 = scalar_lea.vmem %s19_s18, 4096  ;;  %p1503_p1 = scmp.lt.s32.totalorder %s19_s18, %s19_s18 }
   0x7   :  { %p1499_p0 = scmp.ne.s32.totalorder %s19_s18, %s1498_s19  ;;  %p1504_p2 = scmp.lt.s32.totalorder %s1498_s19, %s1498_s19 }
   0x9   :  { %p1505_p3 = por %p1504_p2, %p1503_p1 }
   0xb   :  { %p1506_p4 = pnand %p1505_p3, %p1499_p0 }
   0xd   :  { %1509 = shalt.err (!%p1506_p4)
}
   0xe   :  { %s1535_s20 = smov 512   ;;  %s1536_s21 = smov 32  }
   0xf   :  { %24 = dma.hbm_to_vmem [thread:$0]  %s1911_s0, 4096, %s19_s18, [#allocation6], %s1535_s20, %s1535_s20, %s1536_s21  }
  0x10   :  { %s1537_s3 = smov [#allocation7]  }
  0x11   :  { %s30_s24 = sshll.u32 %s1537_s3, 4  ;;  %s31_s24 = int_to_ptr.vmem [resolvable:$true] %s30_s24 }
  0x12   :  { %s1518_s25 = scalar_lea.vmem %s31_s24, 4096  ;;  %p1523_p6 = scmp.lt.s32.totalorder %s31_s24, %s31_s24 }
  0x13   :  { %p1519_p5 = scmp.ne.s32.totalorder %s31_s24, %s1518_s25  ;;  %p1524_p7 = scmp.lt.s32.totalorder %s1518_s25, %s1518_s25 }
  0x15   :  { %p1525_p8 = por %p1524_p7, %p1523_p6 }
  0x17   :  { %p1526_p9 = pnand %p1525_p8, %p1519_p5 }
  0x19   :  { %1529 = shalt.err (!%p1526_p9)
}
  0x1a   :  { %s1538_s26 = smov 256   ;;  %s1539_s27 = smov 16  }
  0x1b   :  { %36 = dma.hbm_to_vmem [thread:$0]  %s1912_s1, 4096, %s31_s24, [#allocation8], %s1538_s26, %s1538_s26, %s1539_s27  }
  0x1c   :  { %1530 = dma.done.wait [#allocation6], 4096  }
  0x1d   :  { %1531 = vsyncadd [#allocation6], 4294963200 }
  0x1e   :  { %1532 = dma.done.wait [#allocation8], 4096  }
  0x1f   :  { %1533 = vsyncadd [#allocation8], 4294963200  ;;  %v1540_v1 = vmov 0   ;;  %v1578_v2 = vld [vmem:[#allocation7 + $0xe4] ss:$16 sps:$4 sm:$0xff]   ;;  %v1541_v34 = vmov 0.0|0.0  }
  0x20   :  { %285 = vmatprep.mubr.bf16.mxu0 %v1540_v1  ;;  %326 = vmatprep.mubr.bf16.mxu1 %v1540_v1  ;;  %v1580_v3 = vld [vmem:[#allocation7 + $0xe0] ss:$16 sps:$4 sm:$0xff]   ;;  %v1583_v4 = vld [vmem:[#allocation7 + $0xc4] ss:$16 sps:$4 sm:$0xff]   ;;  %v1591_v7 = vld [vmem:[#allocation7 + $0xec] ss:$16 sps:$4 sm:$0xff]  }
  0x21   :  { %253 = vmatprep.subr.bf16.mxu0 %v1578_v2  ;;  %v1586_v5 = vld [vmem:[#allocation7 + $0xc0] ss:$16 sps:$4 sm:$0xff]   ;;  %v1589_v6 = vld [vmem:[#allocation7 + $0xa4] ss:$16 sps:$4 sm:$0xff]   ;;  %v1593_v8 = vld [vmem:[#allocation7 + $0xe8] ss:$16 sps:$4 sm:$0xff]   ;;  %294 = vmatprep.subr.bf16.mxu1 %v1591_v7 }
  0x22   :  { %254 = vmatpush1.bf16.msra.mxu0 %v1580_v3  ;;  %v1596_v9 = vld [vmem:[#allocation7 + $0xa0] ss:$16 sps:$4 sm:$0xff]   ;;  %v1600_v10 = vld [vmem:[#allocation7 + $0x84] ss:$16 sps:$4 sm:$0xff]   ;;  %295 = vmatpush1.bf16.msra.mxu1 %v1593_v8  ;;  %v1603_v11 = vld [vmem:[#allocation7 + $0xcc] ss:$16 sps:$4 sm:$0xff]  }
  0x23   :  { %255 = vmatprep.subr.bf16.mxu0 %v1583_v4  ;;  %v1605_v12 = vld [vmem:[#allocation7 + $0xc8] ss:$16 sps:$4 sm:$0xff]   ;;  %296 = vmatprep.subr.bf16.mxu1 %v1603_v11  ;;  %v1609_v13 = vld [vmem:[#allocation7 + $0x80] ss:$16 sps:$4 sm:$0xff]   ;;  %v1611_v14 = vld [vmem:[#allocation7 + $0x64] ss:$16 sps:$4 sm:$0xff]  }
  0x24   :  { %v1613_v15 = vld [vmem:[#allocation7 + $0xac] ss:$16 sps:$4 sm:$0xff]   ;;  %v1617_v16 = vld [vmem:[#allocation7 + $0xa8] ss:$16 sps:$4 sm:$0xff]   ;;  %v1623_v18 = vld [vmem:[#allocation7 + $0x60] ss:$16 sps:$4 sm:$0xff]  }
  0x25   :  { %v1620_v17 = vld [vmem:[#allocation7 + $0x8c] ss:$16 sps:$4 sm:$0xff]   ;;  %v1626_v19 = vld [vmem:[#allocation7 + $0x44] ss:$16 sps:$4 sm:$0xff]   ;;  %v1629_v20 = vld [vmem:[#allocation7 + $0x88] ss:$16 sps:$4 sm:$0xff]  }
  0x26   :  { %256 = vmatpush1.bf16.msra.mxu0 %v1586_v5  ;;  %297 = vmatpush1.bf16.msra.mxu1 %v1605_v12  ;;  %v1632_v21 = vld [vmem:[#allocation7 + $0x6c] ss:$16 sps:$4 sm:$0xff]   ;;  %v1635_v22 = vld [vmem:[#allocation7 + $0x40] ss:$16 sps:$4 sm:$0xff]   ;;  %v1637_v23 = vld [vmem:[#allocation7 + $0x24] ss:$16 sps:$4 sm:$0xff]  }
  0x27   :  { %257 = vmatprep.subr.bf16.mxu0 %v1589_v6  ;;  %298 = vmatprep.subr.bf16.mxu1 %v1613_v15  ;;  %v1641_v24 = vld [vmem:[#allocation7 + $0x68] ss:$16 sps:$4 sm:$0xff]   ;;  %v1644_v25 = vld [vmem:[#allocation7 + $0x4c] ss:$16 sps:$4 sm:$0xff]   ;;  %v1647_v26 = vld [vmem:[#allocation7 + $0x20] ss:$16 sps:$4 sm:$0xff]  }
  0x28   :  { %v1650_v27 = vld [vmem:[#allocation7 + $0x4] ss:$16 sps:$4 sm:$0xff]   ;;  %v1653_v28 = vld [vmem:[#allocation7 + $0x48] ss:$16 sps:$4 sm:$0xff]   ;;  %v1656_v29 = vld [vmem:[#allocation7 + $0x2c] ss:$16 sps:$4 sm:$0xff]  }
  0x29   :  { %v1659_v30 = vld [vmem:[#allocation7] ss:$16 sps:$4 sm:$0xff]   ;;  %v1663_v31 = vld [vmem:[#allocation7 + $0x28] ss:$16 sps:$4 sm:$0xff]   ;;  %v1666_v32 = vld [vmem:[#allocation7 + $0xc] ss:$16 sps:$4 sm:$0xff]  }
  0x2a   :  { %258 = vmatpush1.bf16.msra.mxu0 %v1596_v9  ;;  %299 = vmatpush1.bf16.msra.mxu1 %v1617_v16  ;;  %v1670_v33 = vld [vmem:[#allocation7 + $0x8] ss:$16 sps:$4 sm:$0xff]   ;;  %v56_v35 = vld [vmem:[#allocation5] sm:$0xff]  ;;  %v58_v47 = vld [vmem:[#allocation5 + $0x10] sm:$0xff]  ;;  %vm1204_vm0 = vcmask 7168  }
  0x2b   :  { %259 = vmatprep.subr.bf16.mxu0 %v1600_v10  ;;  %300 = vmatprep.subr.bf16.mxu1 %v1620_v17  ;;  %v57_v37 = vld [vmem:[#allocation5 + $0x8] sm:$0xff]  ;;  %v59_v51 = vld [vmem:[#allocation5 + $0x18] sm:$0xff] }
  0x2e   :  { %260 = vmatpush1.bf16.msra.mxu0 %v1609_v13  ;;  %301 = vmatpush1.bf16.msra.mxu1 %v1629_v20 }
  0x2f   :  { %261 = vmatprep.subr.bf16.mxu0 %v1611_v14  ;;  %302 = vmatprep.subr.bf16.mxu1 %v1632_v21 }
  0x32   :  { %262 = vmatpush1.bf16.msra.mxu0 %v1623_v18  ;;  %303 = vmatpush1.bf16.msra.mxu1 %v1641_v24 }
  0x33   :  { %263 = vmatprep.subr.bf16.mxu0 %v1626_v19  ;;  %304 = vmatprep.subr.bf16.mxu1 %v1644_v25 }
  0x36   :  { %264 = vmatpush1.bf16.msra.mxu0 %v1635_v22  ;;  %305 = vmatpush1.bf16.msra.mxu1 %v1653_v28 }
  0x37   :  { %265 = vmatprep.subr.bf16.mxu0 %v1637_v23  ;;  %306 = vmatprep.subr.bf16.mxu1 %v1656_v29 }
  0x3a   :  { %266 = vmatpush1.bf16.msra.mxu0 %v1647_v26  ;;  %307 = vmatpush1.bf16.msra.mxu1 %v1663_v31 }
  0x3b   :  { %267 = vmatprep.subr.bf16.mxu0 %v1650_v27  ;;  %308 = vmatprep.subr.bf16.mxu1 %v1666_v32 }
  0x3e   :  { %268 = vmatpush1.bf16.msra.mxu0 %v1659_v30  ;;  %309 = vmatpush1.bf16.msra.mxu1 %v1670_v33 }
  0x3f   :  { %369 = vmatprep.subr.bf16.mxu0 %v1578_v2  ;;  %410 = vmatprep.subr.bf16.mxu1 %v1591_v7 }
  0x41   :  { %286 = vmatmul.mubr.bf16.vlgmr.msra.gmra.mxu0 %v1541_v34  ;;  %327 = vmatmul.mubr.bf16.vlgmr.msra.gmra.mxu1 %v1541_v34 }
  0x42   :  { %370 = vmatpush1.bf16.msra.mxu0 %v1580_v3  ;;  %401 = vmatprep.mubr.bf16.mxu0 %v1540_v1 }
  0x43   :  { %371 = vmatprep.subr.bf16.mxu0 %v1583_v4  ;;  %411 = vmatpush1.bf16.msra.mxu1 %v1593_v8 }
  0x44   :  { %412 = vmatprep.subr.bf16.mxu1 %v1603_v11  ;;  %442 = vmatprep.mubr.bf16.mxu1 %v1540_v1 }
  0x46   :  { %372 = vmatpush1.bf16.msra.mxu0 %v1586_v5 }
  0x47   :  { %373 = vmatprep.subr.bf16.mxu0 %v1589_v6  ;;  %413 = vmatpush1.bf16.msra.mxu1 %v1605_v12 }
  0x48   :  { %414 = vmatprep.subr.bf16.mxu1 %v1613_v15 }
  0x4a   :  { %374 = vmatpush1.bf16.msra.mxu0 %v1596_v9 }
  0x4b   :  { %375 = vmatprep.subr.bf16.mxu0 %v1600_v10  ;;  %415 = vmatpush1.bf16.msra.mxu1 %v1617_v16 }
  0x4c   :  { %416 = vmatprep.subr.bf16.mxu1 %v1620_v17 }
  0x4e   :  { %376 = vmatpush1.bf16.msra.mxu0 %v1609_v13 }
  0x4f   :  { %377 = vmatprep.subr.bf16.mxu0 %v1611_v14  ;;  %417 = vmatpush1.bf16.msra.mxu1 %v1629_v20 }
  0x50   :  { %418 = vmatprep.subr.bf16.mxu1 %v1632_v21 }
  0x52   :  { %378 = vmatpush1.bf16.msra.mxu0 %v1623_v18 }
  0x53   :  { %379 = vmatprep.subr.bf16.mxu0 %v1626_v19  ;;  %419 = vmatpush1.bf16.msra.mxu1 %v1641_v24 }
  0x54   :  { %420 = vmatprep.subr.bf16.mxu1 %v1644_v25 }
  0x56   :  { %380 = vmatpush1.bf16.msra.mxu0 %v1635_v22 }
  0x57   :  { %381 = vmatprep.subr.bf16.mxu0 %v1637_v23  ;;  %421 = vmatpush1.bf16.msra.mxu1 %v1653_v28 }
  0x58   :  { %422 = vmatprep.subr.bf16.mxu1 %v1656_v29 }
  0x5a   :  { %382 = vmatpush1.bf16.msra.mxu0 %v1647_v26 }
  0x5b   :  { %383 = vmatprep.subr.bf16.mxu0 %v1650_v27  ;;  %423 = vmatpush1.bf16.msra.mxu1 %v1663_v31 }
  0x5c   :  { %424 = vmatprep.subr.bf16.mxu1 %v1666_v32 }
  0x5e   :  { %384 = vmatpush1.bf16.msra.mxu0 %v1659_v30 }
  0x5f   :  { %485 = vmatprep.subr.bf16.mxu0 %v1578_v2  ;;  %425 = vmatpush1.bf16.msra.mxu1 %v1670_v33 }
  0x60   :  { %526 = vmatprep.subr.bf16.mxu1 %v1591_v7 }
 0x101   :  { %v287_v36 = vpop.f32.mrf.mxu0  ;;  %v328_v44 = vpop.f32.mrf.mxu1 }
 0x102   :  { %v335_v38 = vadd.f32 %v287_v36, %v56_v35  ;;  %v337_v49 = vadd.f32 %v328_v44, %v58_v47 }
 0x103   :  { %v289_v39 = vpop.f32.mrf.mxu0  ;;  %v330_v46 = vpop.f32.mrf.mxu1 }
 0x104   :  { %v1244_v40 = vmul.f32 -1.442695, %v335_v38  ;;  %v336_v41 = vadd.f32 %v289_v39, %v57_v37  ;;  %v1246_v52 = vmul.f32 -1.442695, %v337_v49  ;;  %v338_v53 = vadd.f32 %v330_v46, %v59_v51  ;;  %v364_v39 = vld [vmem:[#allocation5 + $0x20] sm:$0xff] }
 0x105   :  { %v291_v42 = vpop.f32.mrf.mxu0  ;;  %v332_v48 = vpop.f32.mrf.mxu1 }
 0x106   :  { %1327 = vpow2.f32 %v1244_v40  ;;  %v1245_v43 = vmul.f32 -1.442695, %v336_v41  ;;  %v365_v42 = vld [vmem:[#allocation5 + $0x28] sm:$0xff] }
 0x107   :  { %v292_v45 = vpop.f32.mrf.mxu0  ;;  %v333_v50 = vpop.f32.mrf.mxu1 }
 0x108   :  { %1329 = vpow2.f32 %v1245_v43 }
 0x109   :  { %1331 = vpow2.f32 %v1246_v52 }
 0x10a   :  { %1333 = vtanh.f32 %v338_v53  ;;  %v366_v53 = vld [vmem:[#allocation5 + $0x30] sm:$0xff] }
 0x113   :  { %v1328_v54 = vpop.eup %1327 }
 0x114   :  { %v348_v55 = vadd.f32 1.0, %v1328_v54 }
 0x115   :  { %v1330_v56 = vpop.eup %1329 }
 0x116   :  { %1335 = vrcp.f32 %v348_v55  ;;  %v349_v57 = vadd.f32 1.0, %v1330_v56  ;;  %v1332_v58 = vpop.eup %1331  ;;  %v367_v55 = vld [vmem:[#allocation5 + $0x38] sm:$0xff] }
 0x117   :  { %v1334_v59 = vpop.eup %1333  ;;  %v350_v62 = vadd.f32 1.0, %v1332_v58 }
 0x118   :  { %1337 = vrcp.f32 %v349_v57 }
 0x119   :  { %1339 = vrcp.f32 %v350_v62 }
 0x123   :  { %v1336_v60 = vpop.eup %1335 }
 0x124   :  { %v359_v0 = vmul.f32 %v1336_v60, %v1334_v59 }
 0x125   :  { %v1338_v61 = vpop.eup %1337 }
 0x126   :  { %v358_v63 = vmul.f32 0.0, %v1338_v61  ;;  %v1340_v35 = vpop.eup %1339 }
 0x128   :  { %v1710_v34 = vadd.f32 %v359_v0, %v358_v63 }
 0x12a   :  { %1341 = vtanh.f32 %v1710_v34 }
 0x137   :  { %v1342_v36 = vpop.eup %1341 }
 0x138   :  { %v362_v37 = vmul.f32 %v1342_v36, %v1340_v35 }
 0x13a   :  { %v368_v38 = vpack.c.bf16 %v362_v37, %v362_v37 }
 0x13c   :  { %402 = vmatmul.mubr.bf16.vlgmr.msra.gmra.mxu0 %v368_v38  ;;  %443 = vmatmul.mubr.bf16.vlgmr.msra.gmra.mxu1 %v368_v38 }
 0x13d   :  { %486 = vmatpush1.bf16.msra.mxu0 %v1580_v3  ;;  %527 = vmatpush1.bf16.msra.mxu1 %v1593_v8 }
 0x13e   :  { %487 = vmatprep.subr.bf16.mxu0 %v1583_v4  ;;  %528 = vmatprep.subr.bf16.mxu1 %v1603_v11 }
 0x13f   :  { %517 = vmatprep.mubr.bf16.mxu0 %v1540_v1  ;;  %558 = vmatprep.mubr.bf16.mxu1 %v1540_v1 }
 0x141   :  { %488 = vmatpush1.bf16.msra.mxu0 %v1586_v5  ;;  %529 = vmatpush1.bf16.msra.mxu1 %v1605_v12 }
 0x142   :  { %489 = vmatprep.subr.bf16.mxu0 %v1589_v6  ;;  %530 = vmatprep.subr.bf16.mxu1 %v1613_v15 }
 0x145   :  { %490 = vmatpush1.bf16.msra.mxu0 %v1596_v9  ;;  %531 = vmatpush1.bf16.msra.mxu1 %v1617_v16 }
 0x146   :  { %491 = vmatprep.subr.bf16.mxu0 %v1600_v10  ;;  %532 = vmatprep.subr.bf16.mxu1 %v1620_v17 }
 0x149   :  { %492 = vmatpush1.bf16.msra.mxu0 %v1609_v13  ;;  %533 = vmatpush1.bf16.msra.mxu1 %v1629_v20 }
 0x14a   :  { %493 = vmatprep.subr.bf16.mxu0 %v1611_v14  ;;  %534 = vmatprep.subr.bf16.mxu1 %v1632_v21 }
 0x14d   :  { %494 = vmatpush1.bf16.msra.mxu0 %v1623_v18  ;;  %535 = vmatpush1.bf16.msra.mxu1 %v1641_v24 }
 0x14e   :  { %495 = vmatprep.subr.bf16.mxu0 %v1626_v19  ;;  %536 = vmatprep.subr.bf16.mxu1 %v1644_v25 }
 0x151   :  { %496 = vmatpush1.bf16.msra.mxu0 %v1635_v22  ;;  %537 = vmatpush1.bf16.msra.mxu1 %v1653_v28 }
 0x152   :  { %497 = vmatprep.subr.bf16.mxu0 %v1637_v23  ;;  %538 = vmatprep.subr.bf16.mxu1 %v1656_v29 }
 0x155   :  { %498 = vmatpush1.bf16.msra.mxu0 %v1647_v26  ;;  %539 = vmatpush1.bf16.msra.mxu1 %v1663_v31 }
 0x156   :  { %499 = vmatprep.subr.bf16.mxu0 %v1650_v27  ;;  %540 = vmatprep.subr.bf16.mxu1 %v1666_v32 }
 0x159   :  { %500 = vmatpush1.bf16.msra.mxu0 %v1659_v30  ;;  %541 = vmatpush1.bf16.msra.mxu1 %v1670_v33 }
 0x15a   :  { %601 = vmatprep.subr.bf16.mxu0 %v1578_v2  ;;  %642 = vmatprep.subr.bf16.mxu1 %v1591_v7 }
 0x1fc   :  { %v403_v40 = vpop.f32.mrf.mxu0  ;;  %v444_v41 = vpop.f32.mrf.mxu1 }
 0x1fd   :  { %v451_v43 = vadd.f32 %v403_v40, %v364_v39  ;;  %v453_v54 = vadd.f32 %v444_v41, %v366_v53 }
 0x1fe   :  { %v405_v44 = vpop.f32.mrf.mxu0  ;;  %v446_v45 = vpop.f32.mrf.mxu1 }
 0x1ff   :  { %v1247_v46 = vmul.f32 -1.442695, %v451_v43  ;;  %v452_v47 = vadd.f32 %v405_v44, %v365_v42  ;;  %v1249_v56 = vmul.f32 -1.442695, %v453_v54  ;;  %v454_v58 = vadd.f32 %v446_v45, %v367_v55 }
 0x200   :  { %v407_v48 = vpop.f32.mrf.mxu0  ;;  %v448_v49 = vpop.f32.mrf.mxu1 }
 0x201   :  { %1343 = vpow2.f32 %v1247_v46  ;;  %v1248_v50 = vmul.f32 -1.442695, %v452_v47  ;;  %v481_v46 = vld [vmem:[#allocation5 + $0x48] sm:$0xff] }
 0x202   :  { %v408_v51 = vpop.f32.mrf.mxu0  ;;  %v449_v52 = vpop.f32.mrf.mxu1 }
 0x203   :  { %1345 = vpow2.f32 %v1248_v50 }
 0x204   :  { %1347 = vpow2.f32 %v1249_v56 }
 0x20e   :  { %v1344_v57 = vpop.eup %1343 }
 0x20f   :  { %v464_v59 = vadd.f32 1.0, %v1344_v57  ;;  %v482_v57 = vld [vmem:[#allocation5 + $0x50] sm:$0xff] }
 0x210   :  { %v1346_v60 = vpop.eup %1345 }
 0x211   :  { %1349 = vrcp.f32 %v464_v59  ;;  %v465_v61 = vadd.f32 1.0, %v1346_v60  ;;  %v1348_v62 = vpop.eup %1347  ;;  %v483_v59 = vld [vmem:[#allocation5 + $0x58] sm:$0xff] }
 0x212   :  { %1351 = vtanh.f32 %v454_v58  ;;  %v466_v36 = vadd.f32 1.0, %v1348_v62 }
 0x213   :  { %1353 = vrcp.f32 %v465_v61 }
 0x214   :  { %1355 = vrcp.f32 %v466_v36 }
 0x21e   :  { %v1350_v63 = vpop.eup %1349 }
 0x21f   :  { %v1352_v0 = vpop.eup %1351 }
 0x220   :  { %v1354_v35 = vpop.eup %1353  ;;  %v475_v38 = vmul.f32 %v1352_v0, %v1350_v63 }
 0x221   :  { %v474_v37 = vmul.f32 %v1354_v35, %v1710_v34  ;;  %v1356_v40 = vpop.eup %1355  ;;  %v480_v34 = vld [vmem:[#allocation5 + $0x40] sm:$0xff] }
 0x223   :  { %v1748_v39 = vadd.f32 %v475_v38, %v474_v37 }
 0x225   :  { %1357 = vtanh.f32 %v1748_v39 }
 0x232   :  { %v1358_v41 = vpop.eup %1357 }
 0x233   :  { %v478_v42 = vmul.f32 %v1358_v41, %v1356_v40 }
 0x235   :  { %v484_v43 = vpack.c.bf16 %v478_v42, %v478_v42 }
 0x237   :  { %518 = vmatmul.mubr.bf16.vlgmr.msra.gmra.mxu0 %v484_v43  ;;  %559 = vmatmul.mubr.bf16.vlgmr.msra.gmra.mxu1 %v484_v43 }
 0x238   :  { %602 = vmatpush1.bf16.msra.mxu0 %v1580_v3  ;;  %643 = vmatpush1.bf16.msra.mxu1 %v1593_v8 }
 0x239   :  { %603 = vmatprep.subr.bf16.mxu0 %v1583_v4  ;;  %644 = vmatprep.subr.bf16.mxu1 %v1603_v11 }
 0x23a   :  { %633 = vmatprep.mubr.bf16.mxu0 %v1540_v1  ;;  %674 = vmatprep.mubr.bf16.mxu1 %v1540_v1 }
 0x23c   :  { %604 = vmatpush1.bf16.msra.mxu0 %v1586_v5  ;;  %645 = vmatpush1.bf16.msra.mxu1 %v1605_v12 }
 0x23d   :  { %605 = vmatprep.subr.bf16.mxu0 %v1589_v6  ;;  %646 = vmatprep.subr.bf16.mxu1 %v1613_v15 }
 0x240   :  { %606 = vmatpush1.bf16.msra.mxu0 %v1596_v9  ;;  %647 = vmatpush1.bf16.msra.mxu1 %v1617_v16 }
 0x241   :  { %607 = vmatprep.subr.bf16.mxu0 %v1600_v10  ;;  %648 = vmatprep.subr.bf16.mxu1 %v1620_v17 }
 0x244   :  { %608 = vmatpush1.bf16.msra.mxu0 %v1609_v13  ;;  %649 = vmatpush1.bf16.msra.mxu1 %v1629_v20 }
 0x245   :  { %609 = vmatprep.subr.bf16.mxu0 %v1611_v14  ;;  %650 = vmatprep.subr.bf16.mxu1 %v1632_v21 }
 0x248   :  { %610 = vmatpush1.bf16.msra.mxu0 %v1623_v18  ;;  %651 = vmatpush1.bf16.msra.mxu1 %v1641_v24 }
 0x249   :  { %611 = vmatprep.subr.bf16.mxu0 %v1626_v19  ;;  %652 = vmatprep.subr.bf16.mxu1 %v1644_v25 }
 0x24c   :  { %612 = vmatpush1.bf16.msra.mxu0 %v1635_v22  ;;  %653 = vmatpush1.bf16.msra.mxu1 %v1653_v28 }
 0x24d   :  { %613 = vmatprep.subr.bf16.mxu0 %v1637_v23  ;;  %654 = vmatprep.subr.bf16.mxu1 %v1656_v29 }
 0x250   :  { %614 = vmatpush1.bf16.msra.mxu0 %v1647_v26  ;;  %655 = vmatpush1.bf16.msra.mxu1 %v1663_v31 }
 0x251   :  { %615 = vmatprep.subr.bf16.mxu0 %v1650_v27  ;;  %656 = vmatprep.subr.bf16.mxu1 %v1666_v32 }
 0x254   :  { %616 = vmatpush1.bf16.msra.mxu0 %v1659_v30  ;;  %657 = vmatpush1.bf16.msra.mxu1 %v1670_v33 }
 0x255   :  { %717 = vmatprep.subr.bf16.mxu0 %v1578_v2  ;;  %758 = vmatprep.subr.bf16.mxu1 %v1591_v7 }
 0x2f7   :  { %v519_v44 = vpop.f32.mrf.mxu0  ;;  %v560_v45 = vpop.f32.mrf.mxu1 }
 0x2f8   :  { %v567_v47 = vadd.f32 %v519_v44, %v480_v34  ;;  %v569_v58 = vadd.f32 %v560_v45, %v482_v57 }
 0x2f9   :  { %v521_v48 = vpop.f32.mrf.mxu0  ;;  %v562_v49 = vpop.f32.mrf.mxu1 }
 0x2fa   :  { %v1250_v50 = vmul.f32 -1.442695, %v567_v47  ;;  %v568_v51 = vadd.f32 %v521_v48, %v481_v46  ;;  %v1252_v60 = vmul.f32 -1.442695, %v569_v58  ;;  %v570_v62 = vadd.f32 %v562_v49, %v483_v59 }
 0x2fb   :  { %v523_v52 = vpop.f32.mrf.mxu0  ;;  %v564_v53 = vpop.f32.mrf.mxu1 }
 0x2fc   :  { %1359 = vpow2.f32 %v1250_v50  ;;  %v1251_v54 = vmul.f32 -1.442695, %v568_v51  ;;  %v597_v50 = vld [vmem:[#allocation5 + $0x68] sm:$0xff] }
 0x2fd   :  { %v524_v55 = vpop.f32.mrf.mxu0  ;;  %v565_v56 = vpop.f32.mrf.mxu1 }
 0x2fe   :  { %1361 = vpow2.f32 %v1251_v54 }
 0x2ff   :  { %1363 = vpow2.f32 %v1252_v60 }
 0x309   :  { %v1360_v61 = vpop.eup %1359 }
 0x30a   :  { %v580_v63 = vadd.f32 1.0, %v1360_v61  ;;  %v598_v61 = vld [vmem:[#allocation5 + $0x70] sm:$0xff] }
 0x30b   :  { %v1362_v0 = vpop.eup %1361 }
 0x30c   :  { %1365 = vrcp.f32 %v580_v63  ;;  %v581_v35 = vadd.f32 1.0, %v1362_v0  ;;  %v1364_v36 = vpop.eup %1363  ;;  %v599_v63 = vld [vmem:[#allocation5 + $0x78] sm:$0xff] }
 0x30d   :  { %1367 = vtanh.f32 %v570_v62  ;;  %v582_v41 = vadd.f32 1.0, %v1364_v36 }
 0x30e   :  { %1369 = vrcp.f32 %v581_v35 }
 0x30f   :  { %1371 = vrcp.f32 %v582_v41 }
 0x319   :  { %v1366_v37 = vpop.eup %1365 }
 0x31a   :  { %v1368_v38 = vpop.eup %1367 }
 0x31b   :  { %v1370_v40 = vpop.eup %1369  ;;  %v591_v43 = vmul.f32 %v1368_v38, %v1366_v37 }
 0x31c   :  { %v590_v42 = vmul.f32 %v1370_v40, %v1748_v39  ;;  %v1372_v44 = vpop.eup %1371  ;;  %v596_v39 = vld [vmem:[#allocation5 + $0x60] sm:$0xff] }
 0x31e   :  { %v1786_v34 = vadd.f32 %v591_v43, %v590_v42 }
 0x320   :  { %1373 = vtanh.f32 %v1786_v34 }
 0x32d   :  { %v1374_v45 = vpop.eup %1373 }
 0x32e   :  { %v594_v46 = vmul.f32 %v1374_v45, %v1372_v44 }
 0x330   :  { %v600_v47 = vpack.c.bf16 %v594_v46, %v594_v46 }
 0x332   :  { %634 = vmatmul.mubr.bf16.vlgmr.msra.gmra.mxu0 %v600_v47  ;;  %675 = vmatmul.mubr.bf16.vlgmr.msra.gmra.mxu1 %v600_v47 }
 0x333   :  { %718 = vmatpush1.bf16.msra.mxu0 %v1580_v3  ;;  %759 = vmatpush1.bf16.msra.mxu1 %v1593_v8 }
 0x334   :  { %719 = vmatprep.subr.bf16.mxu0 %v1583_v4  ;;  %760 = vmatprep.subr.bf16.mxu1 %v1603_v11 }
 0x335   :  { %749 = vmatprep.mubr.bf16.mxu0 %v1540_v1  ;;  %790 = vmatprep.mubr.bf16.mxu1 %v1540_v1 }
 0x337   :  { %720 = vmatpush1.bf16.msra.mxu0 %v1586_v5  ;;  %761 = vmatpush1.bf16.msra.mxu1 %v1605_v12 }
 0x338   :  { %721 = vmatprep.subr.bf16.mxu0 %v1589_v6  ;;  %762 = vmatprep.subr.bf16.mxu1 %v1613_v15 }
 0x33b   :  { %722 = vmatpush1.bf16.msra.mxu0 %v1596_v9  ;;  %763 = vmatpush1.bf16.msra.mxu1 %v1617_v16 }
 0x33c   :  { %723 = vmatprep.subr.bf16.mxu0 %v1600_v10  ;;  %764 = vmatprep.subr.bf16.mxu1 %v1620_v17 }
 0x33f   :  { %724 = vmatpush1.bf16.msra.mxu0 %v1609_v13  ;;  %765 = vmatpush1.bf16.msra.mxu1 %v1629_v20 }
 0x340   :  { %725 = vmatprep.subr.bf16.mxu0 %v1611_v14  ;;  %766 = vmatprep.subr.bf16.mxu1 %v1632_v21 }
 0x343   :  { %726 = vmatpush1.bf16.msra.mxu0 %v1623_v18  ;;  %767 = vmatpush1.bf16.msra.mxu1 %v1641_v24 }
 0x344   :  { %727 = vmatprep.subr.bf16.mxu0 %v1626_v19  ;;  %768 = vmatprep.subr.bf16.mxu1 %v1644_v25 }
 0x347   :  { %728 = vmatpush1.bf16.msra.mxu0 %v1635_v22  ;;  %769 = vmatpush1.bf16.msra.mxu1 %v1653_v28 }
 0x348   :  { %729 = vmatprep.subr.bf16.mxu0 %v1637_v23  ;;  %770 = vmatprep.subr.bf16.mxu1 %v1656_v29 }
 0x34b   :  { %730 = vmatpush1.bf16.msra.mxu0 %v1647_v26  ;;  %771 = vmatpush1.bf16.msra.mxu1 %v1663_v31 }
 0x34c   :  { %731 = vmatprep.subr.bf16.mxu0 %v1650_v27  ;;  %772 = vmatprep.subr.bf16.mxu1 %v1666_v32 }
 0x34f   :  { %732 = vmatpush1.bf16.msra.mxu0 %v1659_v30  ;;  %773 = vmatpush1.bf16.msra.mxu1 %v1670_v33 }
 0x350   :  { %833 = vmatprep.subr.bf16.mxu0 %v1578_v2  ;;  %874 = vmatprep.subr.bf16.mxu1 %v1591_v7 }
 0x3f2   :  { %v635_v48 = vpop.f32.mrf.mxu0  ;;  %v676_v49 = vpop.f32.mrf.mxu1 }
 0x3f3   :  { %v683_v51 = vadd.f32 %v635_v48, %v596_v39  ;;  %v685_v62 = vadd.f32 %v676_v49, %v598_v61 }
 0x3f4   :  { %v637_v52 = vpop.f32.mrf.mxu0  ;;  %v678_v53 = vpop.f32.mrf.mxu1 }
 0x3f5   :  { %v1253_v54 = vmul.f32 -1.442695, %v683_v51  ;;  %v684_v55 = vadd.f32 %v637_v52, %v597_v50  ;;  %v1255_v0 = vmul.f32 -1.442695, %v685_v62  ;;  %v686_v36 = vadd.f32 %v678_v53, %v599_v63 }
 0x3f6   :  { %v639_v56 = vpop.f32.mrf.mxu0  ;;  %v680_v57 = vpop.f32.mrf.mxu1 }
 0x3f7   :  { %1375 = vpow2.f32 %v1253_v54  ;;  %v1254_v58 = vmul.f32 -1.442695, %v684_v55  ;;  %v713_v54 = vld [vmem:[#allocation5 + $0x88] sm:$0xff] }
 0x3f8   :  { %v640_v59 = vpop.f32.mrf.mxu0  ;;  %v681_v60 = vpop.f32.mrf.mxu1 }
 0x3f9   :  { %1377 = vpow2.f32 %v1254_v58 }
 0x3fa   :  { %1379 = vpow2.f32 %v1255_v0 }
 0x404   :  { %v1376_v35 = vpop.eup %1375 }
 0x405   :  { %v696_v37 = vadd.f32 1.0, %v1376_v35  ;;  %v714_v35 = vld [vmem:[#allocation5 + $0x90] sm:$0xff] }
 0x406   :  { %v1378_v38 = vpop.eup %1377 }
 0x407   :  { %1381 = vrcp.f32 %v696_v37  ;;  %v697_v40 = vadd.f32 1.0, %v1378_v38  ;;  %v1380_v41 = vpop.eup %1379 }
 0x408   :  { %1383 = vtanh.f32 %v686_v36  ;;  %v698_v45 = vadd.f32 1.0, %v1380_v41  ;;  %v715_v36 = vld [vmem:[#allocation5 + $0x98] sm:$0xff] }
 0x409   :  { %1385 = vrcp.f32 %v697_v40 }
 0x40a   :  { %1387 = vrcp.f32 %v698_v45 }
 0x414   :  { %v1382_v42 = vpop.eup %1381 }
 0x415   :  { %v1384_v43 = vpop.eup %1383 }
 0x416   :  { %v1386_v44 = vpop.eup %1385  ;;  %v707_v47 = vmul.f32 %v1384_v43, %v1382_v42 }
 0x417   :  { %v706_v46 = vmul.f32 %v1386_v44, %v1786_v34  ;;  %v1388_v48 = vpop.eup %1387  ;;  %v712_v34 = vld [vmem:[#allocation5 + $0x80] sm:$0xff] }
 0x419   :  { %v1824_v39 = vadd.f32 %v707_v47, %v706_v46 }
 0x41b   :  { %1389 = vtanh.f32 %v1824_v39 }
 0x428   :  { %v1390_v49 = vpop.eup %1389 }
 0x429   :  { %v710_v50 = vmul.f32 %v1390_v49, %v1388_v48 }
 0x42b   :  { %v716_v51 = vpack.c.bf16 %v710_v50, %v710_v50 }
 0x42d   :  { %750 = vmatmul.mubr.bf16.vlgmr.msra.gmra.mxu0 %v716_v51  ;;  %791 = vmatmul.mubr.bf16.vlgmr.msra.gmra.mxu1 %v716_v51 }
 0x42e   :  { %834 = vmatpush1.bf16.msra.mxu0 %v1580_v3  ;;  %875 = vmatpush1.bf16.msra.mxu1 %v1593_v8 }
 0x42f   :  { %835 = vmatprep.subr.bf16.mxu0 %v1583_v4  ;;  %876 = vmatprep.subr.bf16.mxu1 %v1603_v11 }
 0x430   :  { %865 = vmatprep.mubr.bf16.mxu0 %v1540_v1  ;;  %906 = vmatprep.mubr.bf16.mxu1 %v1540_v1 }
 0x432   :  { %836 = vmatpush1.bf16.msra.mxu0 %v1586_v5  ;;  %877 = vmatpush1.bf16.msra.mxu1 %v1605_v12 }
 0x433   :  { %837 = vmatprep.subr.bf16.mxu0 %v1589_v6  ;;  %878 = vmatprep.subr.bf16.mxu1 %v1613_v15 }
 0x436   :  { %838 = vmatpush1.bf16.msra.mxu0 %v1596_v9  ;;  %879 = vmatpush1.bf16.msra.mxu1 %v1617_v16 }
 0x437   :  { %839 = vmatprep.subr.bf16.mxu0 %v1600_v10  ;;  %880 = vmatprep.subr.bf16.mxu1 %v1620_v17 }
 0x43a   :  { %840 = vmatpush1.bf16.msra.mxu0 %v1609_v13  ;;  %881 = vmatpush1.bf16.msra.mxu1 %v1629_v20 }
 0x43b   :  { %841 = vmatprep.subr.bf16.mxu0 %v1611_v14  ;;  %882 = vmatprep.subr.bf16.mxu1 %v1632_v21 }
 0x43e   :  { %842 = vmatpush1.bf16.msra.mxu0 %v1623_v18  ;;  %883 = vmatpush1.bf16.msra.mxu1 %v1641_v24 }
 0x43f   :  { %843 = vmatprep.subr.bf16.mxu0 %v1626_v19  ;;  %884 = vmatprep.subr.bf16.mxu1 %v1644_v25 }
 0x442   :  { %844 = vmatpush1.bf16.msra.mxu0 %v1635_v22  ;;  %885 = vmatpush1.bf16.msra.mxu1 %v1653_v28 }
 0x443   :  { %845 = vmatprep.subr.bf16.mxu0 %v1637_v23  ;;  %886 = vmatprep.subr.bf16.mxu1 %v1656_v29 }
 0x446   :  { %846 = vmatpush1.bf16.msra.mxu0 %v1647_v26  ;;  %887 = vmatpush1.bf16.msra.mxu1 %v1663_v31 }
 0x447   :  { %847 = vmatprep.subr.bf16.mxu0 %v1650_v27  ;;  %888 = vmatprep.subr.bf16.mxu1 %v1666_v32 }
 0x44a   :  { %848 = vmatpush1.bf16.msra.mxu0 %v1659_v30  ;;  %889 = vmatpush1.bf16.msra.mxu1 %v1670_v33 }
 0x44b   :  { %949 = vmatprep.subr.bf16.mxu0 %v1578_v2  ;;  %990 = vmatprep.subr.bf16.mxu1 %v1591_v7 }
 0x4ed   :  { %v751_v52 = vpop.f32.mrf.mxu0  ;;  %v792_v53 = vpop.f32.mrf.mxu1 }
 0x4ee   :  { %v799_v55 = vadd.f32 %v751_v52, %v712_v34  ;;  %v801_v2 = vadd.f32 %v792_v53, %v714_v35  ;;  %v1466_v35 = vld [vmem:[#allocation7 + $0xa4] ss:$16 sps:$4 sm:$0xff]  }
 0x4ef   :  { %v753_v56 = vpop.f32.mrf.mxu0  ;;  %v794_v57 = vpop.f32.mrf.mxu1 }
 0x4f0   :  { %v1256_v58 = vmul.f32 -1.442695, %v799_v55  ;;  %v800_v59 = vadd.f32 %v753_v56, %v713_v54  ;;  %v1258_v37 = vmul.f32 -1.442695, %v801_v2  ;;  %v802_v40 = vadd.f32 %v794_v57, %v715_v36  ;;  %v1467_v2 = vld [vmem:[#allocation7 + $0xac] ss:$16 sps:$4 sm:$0xff]  }
 0x4f1   :  { %v755_v60 = vpop.f32.mrf.mxu0  ;;  %v796_v61 = vpop.f32.mrf.mxu1  ;;  %v1468_v36 = vld [vmem:[#allocation7 + $0xa0] ss:$16 sps:$4 sm:$0xff]  }
 0x4f2   :  { %1391 = vpow2.f32 %v1256_v58  ;;  %v1257_v62 = vmul.f32 -1.442695, %v800_v59  ;;  %v1460_v59 = vld [vmem:[#allocation7 + $0xe0] ss:$16 sps:$4 sm:$0xff]   ;;  %v1461_v60 = vld [vmem:[#allocation7 + $0xe8] ss:$16 sps:$4 sm:$0xff]  }
 0x4f3   :  { %v756_v63 = vpop.f32.mrf.mxu0  ;;  %v797_v0 = vpop.f32.mrf.mxu1  ;;  %v1462_v61 = vld [vmem:[#allocation7 + $0xc4] ss:$16 sps:$4 sm:$0xff]  }
 0x4f4   :  { %1393 = vpow2.f32 %v1257_v62  ;;  %v1463_v62 = vld [vmem:[#allocation7 + $0xcc] ss:$16 sps:$4 sm:$0xff]   ;;  %v1464_v63 = vld [vmem:[#allocation7 + $0xc0] ss:$16 sps:$4 sm:$0xff]   ;;  %v1465_v0 = vld [vmem:[#allocation7 + $0xc8] ss:$16 sps:$4 sm:$0xff]  }
 0x4f5   :  { %1395 = vpow2.f32 %v1258_v37  ;;  %v1469_v37 = vld [vmem:[#allocation7 + $0xa8] ss:$16 sps:$4 sm:$0xff]  }
 0x4ff   :  { %v1392_v38 = vpop.eup %1391 }
 0x500   :  { %v812_v41 = vadd.f32 1.0, %v1392_v38  ;;  %v1470_v38 = vld [vmem:[#allocation7 + $0x84] ss:$16 sps:$4 sm:$0xff]  }
 0x501   :  { %v1394_v42 = vpop.eup %1393 }
 0x502   :  { %1397 = vrcp.f32 %v812_v41  ;;  %v813_v43 = vadd.f32 1.0, %v1394_v42  ;;  %v1396_v44 = vpop.eup %1395  ;;  %v1472_v41 = vld [vmem:[#allocation7 + $0x80] ss:$16 sps:$4 sm:$0xff]   ;;  %v1473_v42 = vld [vmem:[#allocation7 + $0x88] ss:$16 sps:$4 sm:$0xff]  }
 0x503   :  { %1399 = vtanh.f32 %v802_v40  ;;  %v814_v48 = vadd.f32 1.0, %v1396_v44  ;;  %v1471_v40 = vld [vmem:[#allocation7 + $0x8c] ss:$16 sps:$4 sm:$0xff]   ;;  %v1476_v44 = vld [vmem:[#allocation7 + $0x60] ss:$16 sps:$4 sm:$0xff]  }
 0x504   :  { %1401 = vrcp.f32 %v813_v43  ;;  %v1475_v43 = vld [vmem:[#allocation7 + $0x6c] ss:$16 sps:$4 sm:$0xff]  }
 0x505   :  { %1403 = vrcp.f32 %v814_v48  ;;  %v1480_v48 = vld [vmem:[#allocation7 + $0x40] ss:$16 sps:$4 sm:$0xff]  }
 0x50f   :  { %v1398_v45 = vpop.eup %1397 }
 0x510   :  { %v1400_v46 = vpop.eup %1399 }
 0x511   :  { %v1402_v47 = vpop.eup %1401  ;;  %v823_v50 = vmul.f32 %v1400_v46, %v1398_v45  ;;  %v1477_v45 = vld [vmem:[#allocation7 + $0x68] ss:$16 sps:$4 sm:$0xff]   ;;  %v1478_v46 = vld [vmem:[#allocation7 + $0x44] ss:$16 sps:$4 sm:$0xff]  }
 0x512   :  { %v822_v49 = vmul.f32 %v1402_v47, %v1824_v39  ;;  %v1404_v34 = vpop.eup %1403  ;;  %v1479_v47 = vld [vmem:[#allocation7 + $0x4c] ss:$16 sps:$4 sm:$0xff]  }
 0x514   :  { %v1862_v51 = vadd.f32 %v823_v50, %v822_v49  ;;  %v1481_v49 = vld [vmem:[#allocation7 + $0x48] ss:$16 sps:$4 sm:$0xff]   ;;  %v1482_v50 = vld [vmem:[#allocation7 + $0x24] ss:$16 sps:$4 sm:$0xff]  }
 0x516   :  { %1405 = vtanh.f32 %v1862_v51 }
 0x523   :  { %v1406_v52 = vpop.eup %1405 }
 0x524   :  { %v826_v53 = vmul.f32 %v1406_v52, %v1404_v34  ;;  %v1484_v34 = vld [vmem:[#allocation7 + $0x20] ss:$16 sps:$4 sm:$0xff]   ;;  %v1485_v52 = vld [vmem:[#allocation7 + $0x28] ss:$16 sps:$4 sm:$0xff]  }
 0x526   :  { %v832_v54 = vpack.c.bf16 %v826_v53, %v826_v53  ;;  %v1486_v53 = vld [vmem:[#allocation7 + $0x4] ss:$16 sps:$4 sm:$0xff]  }
 0x528   :  { %866 = vmatmul.mubr.bf16.vlgmr.msra.gmra.mxu0 %v832_v54  ;;  %907 = vmatmul.mubr.bf16.vlgmr.msra.gmra.mxu1 %v832_v54  ;;  %v1487_v54 = vld [vmem:[#allocation7 + $0xc] ss:$16 sps:$4 sm:$0xff]  }
 0x529   :  { %950 = vmatpush1.bf16.msra.mxu0 %v1580_v3  ;;  %991 = vmatpush1.bf16.msra.mxu1 %v1593_v8  ;;  %v1459_v3 = vld [vmem:[#allocation7 + $0xe4] ss:$16 sps:$4 sm:$0xff]   ;;  %v829_v8 = vld [vmem:[#allocation5 + $0xa8] sm:$0xff] }
 0x52a   :  { %951 = vmatprep.subr.bf16.mxu0 %v1583_v4  ;;  %992 = vmatprep.subr.bf16.mxu1 %v1603_v11  ;;  %v828_v4 = vld [vmem:[#allocation5 + $0xa0] sm:$0xff] }
 0x52b   :  { %981 = vmatprep.mubr.bf16.mxu0 %v1540_v1  ;;  %1022 = vmatprep.mubr.bf16.mxu1 %v1540_v1 }
 0x52d   :  { %952 = vmatpush1.bf16.msra.mxu0 %v1586_v5  ;;  %993 = vmatpush1.bf16.msra.mxu1 %v1605_v12 }
 0x52e   :  { %953 = vmatprep.subr.bf16.mxu0 %v1589_v6  ;;  %994 = vmatprep.subr.bf16.mxu1 %v1613_v15 }
 0x531   :  { %954 = vmatpush1.bf16.msra.mxu0 %v1596_v9  ;;  %995 = vmatpush1.bf16.msra.mxu1 %v1617_v16 }
 0x532   :  { %955 = vmatprep.subr.bf16.mxu0 %v1600_v10  ;;  %996 = vmatprep.subr.bf16.mxu1 %v1620_v17 }
 0x535   :  { %956 = vmatpush1.bf16.msra.mxu0 %v1609_v13  ;;  %997 = vmatpush1.bf16.msra.mxu1 %v1629_v20 }
 0x536   :  { %957 = vmatprep.subr.bf16.mxu0 %v1611_v14  ;;  %998 = vmatprep.subr.bf16.mxu1 %v1632_v21  ;;  %v831_v21 = vld [vmem:[#allocation5 + $0xb8] sm:$0xff] }
 0x539   :  { %958 = vmatpush1.bf16.msra.mxu0 %v1623_v18  ;;  %999 = vmatpush1.bf16.msra.mxu1 %v1641_v24 }
 0x53a   :  { %959 = vmatprep.subr.bf16.mxu0 %v1626_v19  ;;  %1000 = vmatprep.subr.bf16.mxu1 %v1644_v25  ;;  %v830_v19 = vld [vmem:[#allocation5 + $0xb0] sm:$0xff] }
 0x53d   :  { %960 = vmatpush1.bf16.msra.mxu0 %v1635_v22  ;;  %1001 = vmatpush1.bf16.msra.mxu1 %v1653_v28 }
 0x53e   :  { %961 = vmatprep.subr.bf16.mxu0 %v1637_v23  ;;  %1002 = vmatprep.subr.bf16.mxu1 %v1656_v29 }
 0x541   :  { %962 = vmatpush1.bf16.msra.mxu0 %v1647_v26  ;;  %1003 = vmatpush1.bf16.msra.mxu1 %v1663_v31 }
 0x542   :  { %963 = vmatprep.subr.bf16.mxu0 %v1650_v27  ;;  %1004 = vmatprep.subr.bf16.mxu1 %v1666_v32 }
 0x545   :  { %964 = vmatpush1.bf16.msra.mxu0 %v1659_v30  ;;  %1005 = vmatpush1.bf16.msra.mxu1 %v1670_v33 }
 0x546   :  { %1065 = vmatprep.subr.bf16.mxu0 %v1459_v3  ;;  %1106 = vmatprep.subr.bf16.mxu1 %v1591_v7  ;;  %v1488_v3 = vld [vmem:[#allocation7] ss:$16 sps:$4 sm:$0xff]  }
 0x5e8   :  { %v867_v5 = vpop.f32.mrf.mxu0  ;;  %v908_v6 = vpop.f32.mrf.mxu1 }
 0x5e9   :  { %v915_v9 = vadd.f32 %v867_v5, %v828_v4  ;;  %v917_v20 = vadd.f32 %v908_v6, %v830_v19  ;;  %v1489_v4 = vld [vmem:[#allocation7 + $0x8] ss:$16 sps:$4 sm:$0xff]   ;;  %v944_v5 = vld [vmem:[#allocation5 + $0xc0] sm:$0xff] }
 0x5ea   :  { %v869_v10 = vpop.f32.mrf.mxu0  ;;  %v910_v11 = vpop.f32.mrf.mxu1 }
 0x5eb   :  { %v1259_v12 = vmul.f32 -1.442695, %v915_v9  ;;  %v916_v13 = vadd.f32 %v869_v10, %v829_v8  ;;  %v1261_v7 = vmul.f32 -1.442695, %v917_v20  ;;  %v918_v23 = vadd.f32 %v910_v11, %v831_v21  ;;  %v945_v9 = vld [vmem:[#allocation5 + $0xc8] sm:$0xff]  ;;  %v946_v20 = vld [vmem:[#allocation5 + $0xd0] sm:$0xff] }
 0x5ec   :  { %v871_v14 = vpop.f32.mrf.mxu0  ;;  %v912_v15 = vpop.f32.mrf.mxu1 }
 0x5ed   :  { %1407 = vpow2.f32 %v1259_v12  ;;  %v1260_v16 = vmul.f32 -1.442695, %v916_v13 }
 0x5ee   :  { %v872_v17 = vpop.f32.mrf.mxu0  ;;  %v913_v18 = vpop.f32.mrf.mxu1 }
 0x5ef   :  { %1409 = vpow2.f32 %v1260_v16 }
 0x5f0   :  { %1411 = vpow2.f32 %v1261_v7  ;;  %v947_v7 = vld [vmem:[#allocation5 + $0xd8] sm:$0xff] }
 0x5fa   :  { %v1408_v22 = vpop.eup %1407 }
 0x5fb   :  { %v928_v24 = vadd.f32 1.0, %v1408_v22 }
 0x5fc   :  { %v1410_v25 = vpop.eup %1409 }
 0x5fd   :  { %1413 = vrcp.f32 %v928_v24  ;;  %v929_v26 = vadd.f32 1.0, %v1410_v25  ;;  %v1412_v27 = vpop.eup %1411 }
 0x5fe   :  { %1415 = vtanh.f32 %v918_v23  ;;  %v930_v31 = vadd.f32 1.0, %v1412_v27 }
 0x5ff   :  { %1417 = vrcp.f32 %v929_v26 }
 0x600   :  { %1419 = vrcp.f32 %v930_v31 }
 0x60a   :  { %v1414_v28 = vpop.eup %1413 }
 0x60b   :  { %v1416_v29 = vpop.eup %1415 }
 0x60c   :  { %v1418_v30 = vpop.eup %1417  ;;  %v939_v33 = vmul.f32 %v1416_v29, %v1414_v28 }
 0x60d   :  { %v938_v32 = vmul.f32 %v1418_v30, %v1862_v51  ;;  %v1420_v55 = vpop.eup %1419  ;;  %v1483_v51 = vld [vmem:[#allocation7 + $0x2c] ss:$16 sps:$4 sm:$0xff]  }
 0x60f   :  { %v1899_v39 = vadd.f32 %v939_v33, %v938_v32 }
 0x611   :  { %1421 = vtanh.f32 %v1899_v39 }
 0x61e   :  { %v1422_v56 = vpop.eup %1421 }
 0x61f   :  { %v942_v57 = vmul.f32 %v1422_v56, %v1420_v55 }
 0x621   :  { %v948_v58 = vpack.c.bf16 %v942_v57, %v942_v57 }
 0x623   :  { %982 = vmatmul.mubr.bf16.vlgmr.msra.gmra.mxu0 %v948_v58  ;;  %1023 = vmatmul.mubr.bf16.vlgmr.msra.gmra.mxu1 %v948_v58 }
 0x624   :  { %1066 = vmatpush1.bf16.msra.mxu0 %v1460_v59  ;;  %1107 = vmatpush1.bf16.msra.mxu1 %v1461_v60 }
 0x625   :  { %1067 = vmatprep.subr.bf16.mxu0 %v1462_v61  ;;  %1108 = vmatprep.subr.bf16.mxu1 %v1463_v62  ;;  %v1060_v61 = vld [vmem:[#allocation5 + $0xe0] sm:$0xff] }
 0x626   :  { %1097 = vmatprep.mubr.bf16.mxu0 %v1540_v1  ;;  %1138 = vmatprep.mubr.bf16.mxu1 %v1540_v1  ;;  %v1474_v1 = vld [vmem:[#allocation7 + $0x64] ss:$16 sps:$4 sm:$0xff]  }
 0x628   :  { %1068 = vmatpush1.bf16.msra.mxu0 %v1464_v63  ;;  %1109 = vmatpush1.bf16.msra.mxu1 %v1465_v0  ;;  %v1061_v0 = vld [vmem:[#allocation5 + $0xe8] sm:$0xff] }
 0x629   :  { %1069 = vmatprep.subr.bf16.mxu0 %v1466_v35  ;;  %1110 = vmatprep.subr.bf16.mxu1 %v1467_v2 }
 0x62c   :  { %1070 = vmatpush1.bf16.msra.mxu0 %v1468_v36  ;;  %1111 = vmatpush1.bf16.msra.mxu1 %v1469_v37 }
 0x62d   :  { %1071 = vmatprep.subr.bf16.mxu0 %v1470_v38  ;;  %1112 = vmatprep.subr.bf16.mxu1 %v1471_v40 }
 0x630   :  { %1072 = vmatpush1.bf16.msra.mxu0 %v1472_v41  ;;  %1113 = vmatpush1.bf16.msra.mxu1 %v1473_v42 }
 0x631   :  { %1073 = vmatprep.subr.bf16.mxu0 %v1474_v1  ;;  %1114 = vmatprep.subr.bf16.mxu1 %v1475_v43  ;;  %v1062_v43 = vld [vmem:[#allocation5 + $0xf0] sm:$0xff] }
 0x634   :  { %1074 = vmatpush1.bf16.msra.mxu0 %v1476_v44  ;;  %1115 = vmatpush1.bf16.msra.mxu1 %v1477_v45  ;;  %v1063_v45 = vld [vmem:[#allocation5 + $0xf8] sm:$0xff] }
 0x635   :  { %1075 = vmatprep.subr.bf16.mxu0 %v1478_v46  ;;  %1116 = vmatprep.subr.bf16.mxu1 %v1479_v47 }
 0x638   :  { %1076 = vmatpush1.bf16.msra.mxu0 %v1480_v48  ;;  %1117 = vmatpush1.bf16.msra.mxu1 %v1481_v49 }
 0x639   :  { %1077 = vmatprep.subr.bf16.mxu0 %v1482_v50  ;;  %1118 = vmatprep.subr.bf16.mxu1 %v1483_v51 }
 0x63c   :  { %1078 = vmatpush1.bf16.msra.mxu0 %v1484_v34  ;;  %1119 = vmatpush1.bf16.msra.mxu1 %v1485_v52 }
 0x63d   :  { %1079 = vmatprep.subr.bf16.mxu0 %v1486_v53  ;;  %1120 = vmatprep.subr.bf16.mxu1 %v1487_v54 }
 0x640   :  { %1080 = vmatpush1.bf16.msra.mxu0 %v1488_v3  ;;  %1121 = vmatpush1.bf16.msra.mxu1 %v1489_v4 }
 0x6e3   :  { %v983_v6 = vpop.f32.mrf.mxu0  ;;  %v1024_v8 = vpop.f32.mrf.mxu1 }
 0x6e4   :  { %v1031_v10 = vadd.f32 %v983_v6, %v944_v5  ;;  %v1033_v21 = vadd.f32 %v1024_v8, %v946_v20 }
 0x6e5   :  { %v985_v11 = vpop.f32.mrf.mxu0  ;;  %v1026_v12 = vpop.f32.mrf.mxu1 }
 0x6e6   :  { %v1262_v13 = vmul.f32 -1.442695, %v1031_v10  ;;  %v1032_v14 = vadd.f32 %v985_v11, %v945_v9  ;;  %v1264_v22 = vmul.f32 -1.442695, %v1033_v21  ;;  %v1034_v24 = vadd.f32 %v1026_v12, %v947_v7  ;;  %v1268_v10 = vld [vmem:[%s1913_s2] ss:$0 sm:$0xff] }
 0x6e7   :  { %v987_v15 = vpop.f32.mrf.mxu0  ;;  %v1028_v16 = vpop.f32.mrf.mxu1 }
 0x6e8   :  { %1423 = vpow2.f32 %v1262_v13  ;;  %v1263_v17 = vmul.f32 -1.442695, %v1032_v14  ;;  %v1269_v13 = vld [vmem:[#allocation4] ss:$0 sm:$0xff] }
 0x6e9   :  { %v988_v18 = vpop.f32.mrf.mxu0  ;;  %v1029_v19 = vpop.f32.mrf.mxu1 }
 0x6ea   :  { %1425 = vpow2.f32 %v1263_v17 }
 0x6eb   :  { %1427 = vpow2.f32 %v1264_v22 }
 0x6f5   :  { %v1424_v23 = vpop.eup %1423 }
 0x6f6   :  { %v1044_v25 = vadd.f32 1.0, %v1424_v23 }
 0x6f7   :  { %v1426_v26 = vpop.eup %1425 }
 0x6f8   :  { %1429 = vrcp.f32 %v1044_v25  ;;  %v1045_v27 = vadd.f32 1.0, %v1426_v26  ;;  %v1428_v28 = vpop.eup %1427 }
 0x6f9   :  { %1431 = vtanh.f32 %v1034_v24  ;;  %v1046_v32 = vadd.f32 1.0, %v1428_v28 }
 0x6fa   :  { %1433 = vrcp.f32 %v1045_v27 }
 0x6fb   :  { %1435 = vrcp.f32 %v1046_v32 }
 0x705   :  { %v1430_v29 = vpop.eup %1429 }
 0x706   :  { %v1432_v30 = vpop.eup %1431 }
 0x707   :  { %v1434_v31 = vpop.eup %1433  ;;  %v1055_v55 = vmul.f32 %v1432_v30, %v1430_v29 }
 0x708   :  { %v1054_v33 = vmul.f32 %v1434_v31, %v1899_v39  ;;  %v1436_v57 = vpop.eup %1435 }
 0x70a   :  { %v1056_v56 = vadd.f32 %v1055_v55, %v1054_v33 }
 0x70c   :  { %1437 = vtanh.f32 %v1056_v56 }
 0x719   :  { %v1438_v58 = vpop.eup %1437 }
 0x71a   :  { %v1058_v59 = vmul.f32 %v1438_v58, %v1436_v57 }
 0x71c   :  { %v1064_v60 = vpack.c.bf16 %v1058_v59, %v1058_v59 }
 0x71e   :  { %1098 = vmatmul.mubr.bf16.vlgmr.msra.gmra.mxu0 %v1064_v60  ;;  %1139 = vmatmul.mubr.bf16.vlgmr.msra.gmra.mxu1 %v1064_v60 }
 0x7de   :  { %v1099_v62 = vpop.f32.mrf.mxu0  ;;  %v1140_v63 = vpop.f32.mrf.mxu1 }
 0x7df   :  { %v1147_v35 = vadd.f32 %v1099_v62, %v1060_v61  ;;  %v1149_v44 = vadd.f32 %v1140_v63, %v1062_v43 }
 0x7e0   :  { %v1101_v2 = vpop.f32.mrf.mxu0  ;;  %v1142_v36 = vpop.f32.mrf.mxu1 }
 0x7e1   :  { %v1265_v37 = vmul.f32 -1.442695, %v1147_v35  ;;  %v1148_v38 = vadd.f32 %v1101_v2, %v1061_v0  ;;  %v1267_v46 = vmul.f32 -1.442695, %v1149_v44  ;;  %v1150_v48 = vadd.f32 %v1142_v36, %v1063_v45 }
 0x7e2   :  { %v1103_v39 = vpop.f32.mrf.mxu0  ;;  %v1144_v40 = vpop.f32.mrf.mxu1 }
 0x7e3   :  { %1439 = vpow2.f32 %v1265_v37  ;;  %v1266_v41 = vmul.f32 -1.442695, %v1148_v38 }
 0x7e4   :  { %v1104_v42 = vpop.f32.mrf.mxu0  ;;  %v1145_v1 = vpop.f32.mrf.mxu1 }
 0x7e5   :  { %1441 = vpow2.f32 %v1266_v41 }
 0x7e6   :  { %1443 = vpow2.f32 %v1267_v46 }
 0x7f0   :  { %v1440_v47 = vpop.eup %1439 }
 0x7f1   :  { %v1160_v49 = vadd.f32 1.0, %v1440_v47 }
 0x7f2   :  { %v1442_v50 = vpop.eup %1441 }
 0x7f3   :  { %1445 = vrcp.f32 %v1160_v49  ;;  %v1161_v51 = vadd.f32 1.0, %v1442_v50  ;;  %v1444_v34 = vpop.eup %1443 }
 0x7f4   :  { %1447 = vtanh.f32 %v1150_v48  ;;  %v1162_v3 = vadd.f32 1.0, %v1444_v34 }
 0x7f5   :  { %1449 = vrcp.f32 %v1161_v51 }
 0x7f6   :  { %1451 = vrcp.f32 %v1162_v3 }
 0x800   :  { %v1446_v52 = vpop.eup %1445 }
 0x801   :  { %v1448_v53 = vpop.eup %1447 }
 0x802   :  { %v1450_v54 = vpop.eup %1449  ;;  %v1171_v4 = vmul.f32 %v1448_v53, %v1446_v52 }
 0x803   :  { %v1170_v5 = vmul.f32 %v1450_v54, %v1056_v56  ;;  %v1452_v8 = vpop.eup %1451 }
 0x805   :  { %v1172_v6 = vadd.f32 %v1171_v4, %v1170_v5 }
 0x807   :  { %1453 = vtanh.f32 %v1172_v6 }
 0x814   :  { %v1454_v9 = vpop.eup %1453 }
 0x815   :  { %v1174_v11 = vmul.f32 %v1454_v9, %v1452_v8 }
 0x817   :  { %v1187_v12 = vmul.f32 %v1268_v10, %v1174_v11 }
 0x819   :  { %1188 = vadd.xlane.f32.xlu0 %v1187_v12 }
 0x8a2   :  { %v1189_v14 = vpop.xlane.xlu0 %1188 }
 0x8a3   :  { %v1197_v15 = vadd.f32 %v1269_v13, %v1189_v14 }
 0x8a5   :  { %v1270_v16 = vmul.f32 -1.442695, %v1197_v15 }
 0x8a7   :  { %1455 = vpow2.f32 %v1270_v16 }
 0x8b4   :  { %v1456_v17 = vpop.eup %1455 }
 0x8b5   :  { %v1201_v18 = vadd.f32 1.0, %v1456_v17 }
 0x8b7   :  { %1457 = vrcp.f32 %v1201_v18 }
 0x8c4   :  { %v1458_v19 = vpop.eup %1457 }
 0x8c5   :  { %1205 = vst.msk [vmem:[%s1915_s4] sm:$0xff] %vm1204_vm0, %v1458_v19 }
 0x8c6   :  { %1210 = vsyncpa [#allocation6], 1 }
 0x8c7   :  { %1211 = vsyncpa [#allocation8], 1 }

</bundles_post_ra>
